<compile_context>
chip_gen: v7x
topology: tpu7x:2x2x1
jax: 0.10.0
libtpu: 0.0.40
codegen_flags: <defaults>
</compile_context>

<pallas_src>
import jax
import jax.numpy as jnp
import numpy as np
from jax.experimental import pallas as pl
from jax.experimental.pallas import tpu as pltpu


# ---------------------------------------------------------------------------
# helpers shared by the kernel and the pure-JAX reference
# ---------------------------------------------------------------------------
def _elu(z):
    # F.elu (alpha=1); exp only sees the non-positive range.
    return jnp.where(z > 0, z, jnp.exp(jnp.minimum(z, 0.0)) - 1.0)


def _sigmoid(z):
    return 1.0 / (1.0 + jnp.exp(-z))


def _split_f32(v):
    """Split v into (hi, lo) with hi exactly representable in bf16."""
    hi = v.astype(jnp.bfloat16).astype(jnp.float32)
    return hi, v - hi


def _acc_dot(v_hi, v_lo, w_hi, w_lo):
    """~f32-accurate MXU contraction of hi/lo-split operands (drops lo*lo)."""
    f32 = jnp.float32
    return (jnp.dot(v_hi, w_hi, preferred_element_type=f32)
            + jnp.dot(v_lo, w_hi, preferred_element_type=f32)
            + jnp.dot(v_hi, w_lo, preferred_element_type=f32))


# ---------------------------------------------------------------------------
# kernel
# ---------------------------------------------------------------------------
def _residual_block_kernel(x_ref, s_ref, w1p_ref, w1c_ref, b1_ref,
                           wagp_ref, wagc_ref, bag_ref, o_ref):
    f32 = jnp.float32
    x = x_ref[...]                        # (H, L) lane-dense tile, L = W*bt*C
    s = s_ref[...]                        # (H, H) one-hot "previous row" matrix

    # ---- input_conv: elu -> conv2x2 -> elu ----
    y_hi, y_lo = _split_f32(_elu(x))
    yu_hi = jnp.dot(s, y_hi, preferred_element_type=f32)   # rows shifted to h-1
    yu_lo = jnp.dot(s, y_lo, preferred_element_type=f32)
    h = _elu(_acc_dot(yu_hi, yu_lo, w1p_ref[0], w1p_ref[1])
             + _acc_dot(y_hi, y_lo, w1c_ref[0], w1c_ref[1])
             + b1_ref[...])

    # ---- output_conv (value | gate halves fused along lanes) ----
    h_hi, h_lo = _split_f32(h)
    hu_hi = jnp.dot(s, h_hi, preferred_element_type=f32)
    hu_lo = jnp.dot(s, h_lo, preferred_element_type=f32)
    ag = (_acc_dot(hu_hi, hu_lo, wagp_ref[0], wagp_ref[1])
          + _acc_dot(h_hi, h_lo, wagc_ref[0], wagc_ref[1])
          + bag_ref[...])                 # (H, 2L)

    # ---- gated residual, one wide unmasked store ----
    L = x.shape[-1]
    o_ref[...] = x + ag[:, :L] * _sigmoid(ag[:, L:])


# ---------------------------------------------------------------------------
# wrapper: relayout + lane-space weight construction + pallas_call
# ---------------------------------------------------------------------------
def residual_block(x_nchw, w1, b1, w2, b2):
    """x_nchw: (B, C, H, W); w1: (C, C, 2, 2); b1: (C,);
    w2: (2C, C, 2, 2); b2: (2C,)  -- torch OIHW conv parameters."""
    f32 = jnp.float32
    B, C, H, W = x_nchw.shape

    # Pick the smallest divisor of B that makes the flattened lane axis >= 128
    # wide (falls back to all of B for very small problems).
    bt = B
    for cand in range(1, B + 1):
        if B % cand == 0 and W * cand * C >= 128:
            bt = cand
            break
    Bo = B // bt                 # grid size: independent batch groups (no halo)
    G = bt * C                   # lanes per image column
    L = W * G                    # lane width of one block

    # --- relayout NCHW -> (Bo, H, L) with lane order (w, batch-in-group, c) ---
    x_g = x_nchw.astype(f32).reshape(Bo, bt, C, H, W)
    x_flat = jnp.transpose(x_g, (0, 3, 4, 1, 2)).reshape(Bo, H, L)

    # --- build lane-space conv weights once, outside the kernel ---
    w1_k = jnp.transpose(w1.astype(f32), (2, 3, 1, 0))      # (kh, kw, Cin, C)
    w2_k = jnp.transpose(w2.astype(f32), (2, 3, 1, 0))      # (kh, kw, Cin, 2C)
    w2a_k, w2b_k = w2_k[..., :C], w2_k[..., C:]              # value / gate halves

    eye_wg = jnp.eye(W * bt, dtype=f32)

    def kron_big(wtap):          # (Cin, D) -> block-diagonal (L, W*bt*D)
        return jnp.kron(eye_wg, wtap)

    def fold_col_shift(wbig):
        # A kj=0 tap reads column w-1: shift_cols(v) @ Wbig == v @ shifted(Wbig),
        # so the column shift is folded into the weight matrix here.
        return jnp.concatenate(
            [wbig[G:], jnp.zeros((G, wbig.shape[1]), f32)], axis=0)

    def conv_weights(wa, wb=None):
        def tap(ki, kj):
            m = kron_big(wa[ki, kj])
            if wb is not None:   # fuse value|gate halves along output lanes
                m = jnp.concatenate([m, kron_big(wb[ki, kj])], axis=1)
            return m
        w_prev = fold_col_shift(tap(0, 0)) + tap(0, 1)   # taps reading row h-1
        w_curr = fold_col_shift(tap(1, 0)) + tap(1, 1)   # taps reading row h
        return w_prev, w_curr

    W1p, W1c = conv_weights(w1_k)                        # (L, L) each
    Wagp, Wagc = conv_weights(w2a_k, w2b_k)              # (L, 2L) each

    def split_stack(w):          # stack (hi, lo) for the precision-safe matmul
        hi = w.astype(jnp.bfloat16).astype(f32)
        return jnp.stack([hi, w - hi])

    W1p, W1c, Wagp, Wagc = map(split_stack, (W1p, W1c, Wagp, Wagc))

    b1_flat = jnp.tile(b1.astype(f32), W * bt).reshape(1, L)
    bag_flat = jnp.concatenate(
        [jnp.tile(b2[:C].astype(f32), W * bt),
         jnp.tile(b2[C:].astype(f32), W * bt)]).reshape(1, 2 * L)

    # One-hot "previous row" matrix: (S @ v)[i] = v[i-1], zero-filled at row 0.
    shift_mat = jnp.eye(H, k=-1, dtype=f32)

    whole3 = lambda i: (0, 0, 0)
    whole2 = lambda i: (0, 0)
    out_flat = pl.pallas_call(
        _residual_block_kernel,
        out_shape=jax.ShapeDtypeStruct((Bo, H, L), f32),
        grid=(Bo,),
        in_specs=[
            pl.BlockSpec((None, H, L), lambda i: (i, 0, 0)),   # x tile (lane-dense)
            pl.BlockSpec((H, H), whole2),                      # row-shift matrix
            pl.BlockSpec((2, L, L), whole3),                   # input_conv, prev-row taps
            pl.BlockSpec((2, L, L), whole3),                   # input_conv, curr-row taps
            pl.BlockSpec((1, L), whole2),                      # input_conv bias
            pl.BlockSpec((2, L, 2 * L), whole3),               # output_conv, prev-row taps
            pl.BlockSpec((2, L, 2 * L), whole3),               # output_conv, curr-row taps
            pl.BlockSpec((1, 2 * L), whole2),                  # output_conv bias
        ],
        out_specs=pl.BlockSpec((None, H, L), lambda i: (i, 0, 0)),
        compiler_params=pltpu.CompilerParams(
            dimension_semantics=("parallel",),   # batch groups -> v7x megacore
            vmem_limit_bytes=32 * 1024 * 1024),
    )(x_flat, shift_mat, W1p, W1c, b1_flat, Wagp, Wagc, bag_flat)

    # --- relayout back to NCHW ---
    out = out_flat.reshape(Bo, H, W, bt, C)
    out = jnp.transpose(out, (0, 3, 4, 1, 2)).reshape(B, C, H, W)
    return out.astype(x_nchw.dtype)


# ---------------------------------------------------------------------------
# pure-JAX reference of the PyTorch forward pass (NCHW)
# ---------------------------------------------------------------------------
def _reference(x, w1, b1, w2, b2):
    def conv(z, w, b):
        y = jax.lax.conv_general_dilated(
            z, w, window_strides=(1, 1), padding=((1, 1), (1, 1)),
            dimension_numbers=("NCHW", "OIHW", "NCHW"),
            precision=jax.lax.Precision.HIGHEST)
        return y + b[None, :, None, None]

    _, C, H, W = x.shape
    h = _elu(conv(_elu(x), w1, b1))[:, :, :H, :W]
    y = conv(h, w2, b2)[:, :, :H, :W]
    return x + y[:, :C] * _sigmoid(y[:, C:])


if __name__ == "__main__":
    B, C, H, W = 2, 4, 16, 16
    key = jax.random.PRNGKey(0)
    kx, k1, k2, k3, k4 = jax.random.split(key, 5)
    x = jax.random.normal(kx, (B, C, H, W), jnp.float32)
    w1 = 0.3 * jax.random.normal(k1, (C, C, 2, 2), jnp.float32)       # input_conv
    b1 = 0.1 * jax.random.normal(k2, (C,), jnp.float32)
    w2 = 0.3 * jax.random.normal(k3, (2 * C, C, 2, 2), jnp.float32)   # output_conv
    b2 = 0.1 * jax.random.normal(k4, (2 * C,), jnp.float32)

    out = jax.block_until_ready(jax.jit(residual_block)(x, w1, b1, w2, b2))
    assert out.shape == (B, C, H, W)

    ref = _reference(x, w1, b1, w2, b2)
    # The split-f32 MXU path is accurate to ~1e-5 vs. the HIGHEST-precision
    # conv reference; tolerance below leaves margin while still catching any
    # layout / tap / gating mistake (those produce O(0.1-1) errors).
    np.testing.assert_allclose(np.asarray(out), np.asarray(ref),
                               rtol=5e-4, atol=5e-4)
    print("KERNEL_OK")
</pallas_src>

<mosaic_0001>
module attributes {stable_mosaic.version = 11 : i64} {
  func.func @_residual_block_kernel(%arg0: i32, %arg1: memref<1x16x128xf32, #tpu.memory_space<vmem>>, %arg2: memref<16x16xf32, #tpu.memory_space<vmem>>, %arg3: memref<2x128x128xf32, #tpu.memory_space<vmem>>, %arg4: memref<2x128x128xf32, #tpu.memory_space<vmem>>, %arg5: memref<1x128xf32, #tpu.memory_space<vmem>>, %arg6: memref<2x128x256xf32, #tpu.memory_space<vmem>>, %arg7: memref<2x128x256xf32, #tpu.memory_space<vmem>>, %arg8: memref<1x256xf32, #tpu.memory_space<vmem>>, %arg9: memref<1x16x128xf32, #tpu.memory_space<vmem>>) attributes {dimension_semantics = [#tpu.dimension_semantics<parallel>], iteration_bounds = array<i64: 1>, scalar_prefetch = 0 : i64, scratch_operands = 0 : i64, tpu.core_type = #tpu.core_type<tc>, window_params = [{transform_indices = @transform_0, window_bounds = array<i64: 1, 16, 128>}, {pipeline_mode = #tpu.pipeline_mode<synchronous>, transform_indices = @transform_1, window_bounds = array<i64: 16, 16>}, {pipeline_mode = #tpu.pipeline_mode<synchronous>, transform_indices = @transform_2, window_bounds = array<i64: 2, 128, 128>}, {pipeline_mode = #tpu.pipeline_mode<synchronous>, transform_indices = @transform_3, window_bounds = array<i64: 2, 128, 128>}, {pipeline_mode = #tpu.pipeline_mode<synchronous>, transform_indices = @transform_4, window_bounds = array<i64: 1, 128>}, {pipeline_mode = #tpu.pipeline_mode<synchronous>, transform_indices = @transform_5, window_bounds = array<i64: 2, 128, 256>}, {pipeline_mode = #tpu.pipeline_mode<synchronous>, transform_indices = @transform_6, window_bounds = array<i64: 2, 128, 256>}, {pipeline_mode = #tpu.pipeline_mode<synchronous>, transform_indices = @transform_7, window_bounds = array<i64: 1, 256>}, {transform_indices = @transform_8, window_bounds = array<i64: 1, 16, 128>}]} {
    %c0 = arith.constant 0 : index
    %c0_0 = arith.constant 0 : index
    %c0_1 = arith.constant 0 : index
    %0 = vector.load %arg1[%c0, %c0_0, %c0_1] : memref<1x16x128xf32, #tpu.memory_space<vmem>>, vector<1x16x128xf32>
    %1 = vector.shape_cast %0 : vector<1x16x128xf32> to vector<16x128xf32>
    %c0_2 = arith.constant 0 : index
    %c0_3 = arith.constant 0 : index
    %2 = vector.load %arg2[%c0_2, %c0_3] : memref<16x16xf32, #tpu.memory_space<vmem>>, vector<16x16xf32>
    %cst = arith.constant 0.000000e+00 : f32
    %3 = vector.broadcast %cst : f32 to vector<16x128xf32>
    %4 = arith.cmpf ogt, %1, %3 : vector<16x128xf32>
    %cst_4 = arith.constant 0.000000e+00 : f32
    %5 = vector.broadcast %cst_4 : f32 to vector<16x128xf32>
    %6 = arith.minimumf %1, %5 : vector<16x128xf32>
    %7 = math.exp %6 : vector<16x128xf32>
    %cst_5 = arith.constant 1.000000e+00 : f32
    %8 = vector.broadcast %cst_5 : f32 to vector<16x128xf32>
    %9 = arith.subf %7, %8 : vector<16x128xf32>
    %10 = arith.select %4, %1, %9 : vector<16x128xi1>, vector<16x128xf32>
    %11 = arith.truncf %10 : vector<16x128xf32> to vector<16x128xbf16>
    %12 = arith.extf %11 : vector<16x128xbf16> to vector<16x128xf32>
    %13 = arith.subf %10, %12 : vector<16x128xf32>
    %cst_6 = arith.constant dense<0.000000e+00> : vector<16x128xf32>
    %14 = tpu.matmul %2, %12, %cst_6 {dimension_numbers = #tpu.dot_dimension_numbers<[1], [0], [0], [1], [0, 0, 1, 1], [], []>} : vector<16x16xf32>, vector<16x128xf32>, vector<16x128xf32> -> vector<16x128xf32>
    %cst_7 = arith.constant dense<0.000000e+00> : vector<16x128xf32>
    %15 = tpu.matmul %2, %13, %cst_7 {dimension_numbers = #tpu.dot_dimension_numbers<[1], [0], [0], [1], [0, 0, 1, 1], [], []>} : vector<16x16xf32>, vector<16x128xf32>, vector<16x128xf32> -> vector<16x128xf32>
    %c0_8 = arith.constant 0 : index
    %c0_9 = arith.constant 0 : index
    %c0_10 = arith.constant 0 : index
    %16 = vector.load %arg3[%c0_8, %c0_9, %c0_10] : memref<2x128x128xf32, #tpu.memory_space<vmem>>, vector<1x128x128xf32>
    %17 = vector.shape_cast %16 : vector<1x128x128xf32> to vector<128x128xf32>
    %c1 = arith.constant 1 : index
    %c0_11 = arith.constant 0 : index
    %c0_12 = arith.constant 0 : index
    %18 = vector.load %arg3[%c1, %c0_11, %c0_12] : memref<2x128x128xf32, #tpu.memory_space<vmem>>, vector<1x128x128xf32>
    %19 = vector.shape_cast %18 : vector<1x128x128xf32> to vector<128x128xf32>
    %cst_13 = arith.constant dense<0.000000e+00> : vector<16x128xf32>
    %20 = tpu.matmul %14, %17, %cst_13 {dimension_numbers = #tpu.dot_dimension_numbers<[1], [0], [0], [1], [0, 0, 1, 1], [], []>} : vector<16x128xf32>, vector<128x128xf32>, vector<16x128xf32> -> vector<16x128xf32>
    %cst_14 = arith.constant dense<0.000000e+00> : vector<16x128xf32>
    %21 = tpu.matmul %15, %17, %cst_14 {dimension_numbers = #tpu.dot_dimension_numbers<[1], [0], [0], [1], [0, 0, 1, 1], [], []>} : vector<16x128xf32>, vector<128x128xf32>, vector<16x128xf32> -> vector<16x128xf32>
    %22 = arith.addf %20, %21 : vector<16x128xf32>
    %cst_15 = arith.constant dense<0.000000e+00> : vector<16x128xf32>
    %23 = tpu.matmul %14, %19, %cst_15 {dimension_numbers = #tpu.dot_dimension_numbers<[1], [0], [0], [1], [0, 0, 1, 1], [], []>} : vector<16x128xf32>, vector<128x128xf32>, vector<16x128xf32> -> vector<16x128xf32>
    %24 = arith.addf %22, %23 : vector<16x128xf32>
    %c0_16 = arith.constant 0 : index
    %c0_17 = arith.constant 0 : index
    %c0_18 = arith.constant 0 : index
    %25 = vector.load %arg4[%c0_16, %c0_17, %c0_18] : memref<2x128x128xf32, #tpu.memory_space<vmem>>, vector<1x128x128xf32>
    %26 = vector.shape_cast %25 : vector<1x128x128xf32> to vector<128x128xf32>
    %c1_19 = arith.constant 1 : index
    %c0_20 = arith.constant 0 : index
    %c0_21 = arith.constant 0 : index
    %27 = vector.load %arg4[%c1_19, %c0_20, %c0_21] : memref<2x128x128xf32, #tpu.memory_space<vmem>>, vector<1x128x128xf32>
    %28 = vector.shape_cast %27 : vector<1x128x128xf32> to vector<128x128xf32>
    %cst_22 = arith.constant dense<0.000000e+00> : vector<16x128xf32>
    %29 = tpu.matmul %12, %26, %cst_22 {dimension_numbers = #tpu.dot_dimension_numbers<[1], [0], [0], [1], [0, 0, 1, 1], [], []>} : vector<16x128xf32>, vector<128x128xf32>, vector<16x128xf32> -> vector<16x128xf32>
    %cst_23 = arith.constant dense<0.000000e+00> : vector<16x128xf32>
    %30 = tpu.matmul %13, %26, %cst_23 {dimension_numbers = #tpu.dot_dimension_numbers<[1], [0], [0], [1], [0, 0, 1, 1], [], []>} : vector<16x128xf32>, vector<128x128xf32>, vector<16x128xf32> -> vector<16x128xf32>
    %31 = arith.addf %29, %30 : vector<16x128xf32>
    %cst_24 = arith.constant dense<0.000000e+00> : vector<16x128xf32>
    %32 = tpu.matmul %12, %28, %cst_24 {dimension_numbers = #tpu.dot_dimension_numbers<[1], [0], [0], [1], [0, 0, 1, 1], [], []>} : vector<16x128xf32>, vector<128x128xf32>, vector<16x128xf32> -> vector<16x128xf32>
    %33 = arith.addf %31, %32 : vector<16x128xf32>
    %34 = arith.addf %24, %33 : vector<16x128xf32>
    %c0_25 = arith.constant 0 : index
    %c0_26 = arith.constant 0 : index
    %35 = vector.load %arg5[%c0_25, %c0_26] : memref<1x128xf32, #tpu.memory_space<vmem>>, vector<1x128xf32>
    %36 = vector.broadcast %35 : vector<1x128xf32> to vector<16x128xf32>
    %37 = arith.addf %34, %36 : vector<16x128xf32>
    %cst_27 = arith.constant 0.000000e+00 : f32
    %38 = vector.broadcast %cst_27 : f32 to vector<16x128xf32>
    %39 = arith.cmpf ogt, %37, %38 : vector<16x128xf32>
    %cst_28 = arith.constant 0.000000e+00 : f32
    %40 = vector.broadcast %cst_28 : f32 to vector<16x128xf32>
    %41 = arith.minimumf %37, %40 : vector<16x128xf32>
    %42 = math.exp %41 : vector<16x128xf32>
    %cst_29 = arith.constant 1.000000e+00 : f32
    %43 = vector.broadcast %cst_29 : f32 to vector<16x128xf32>
    %44 = arith.subf %42, %43 : vector<16x128xf32>
    %45 = arith.select %39, %37, %44 : vector<16x128xi1>, vector<16x128xf32>
    %46 = arith.truncf %45 : vector<16x128xf32> to vector<16x128xbf16>
    %47 = arith.extf %46 : vector<16x128xbf16> to vector<16x128xf32>
    %48 = arith.subf %45, %47 : vector<16x128xf32>
    %cst_30 = arith.constant dense<0.000000e+00> : vector<16x128xf32>
    %49 = tpu.matmul %2, %47, %cst_30 {dimension_numbers = #tpu.dot_dimension_numbers<[1], [0], [0], [1], [0, 0, 1, 1], [], []>} : vector<16x16xf32>, vector<16x128xf32>, vector<16x128xf32> -> vector<16x128xf32>
    %cst_31 = arith.constant dense<0.000000e+00> : vector<16x128xf32>
    %50 = tpu.matmul %2, %48, %cst_31 {dimension_numbers = #tpu.dot_dimension_numbers<[1], [0], [0], [1], [0, 0, 1, 1], [], []>} : vector<16x16xf32>, vector<16x128xf32>, vector<16x128xf32> -> vector<16x128xf32>
    %c0_32 = arith.constant 0 : index
    %c0_33 = arith.constant 0 : index
    %c0_34 = arith.constant 0 : index
    %51 = vector.load %arg6[%c0_32, %c0_33, %c0_34] : memref<2x128x256xf32, #tpu.memory_space<vmem>>, vector<1x128x256xf32>
    %52 = vector.shape_cast %51 : vector<1x128x256xf32> to vector<128x256xf32>
    %c1_35 = arith.constant 1 : index
    %c0_36 = arith.constant 0 : index
    %c0_37 = arith.constant 0 : index
    %53 = vector.load %arg6[%c1_35, %c0_36, %c0_37] : memref<2x128x256xf32, #tpu.memory_space<vmem>>, vector<1x128x256xf32>
    %54 = vector.shape_cast %53 : vector<1x128x256xf32> to vector<128x256xf32>
    %cst_38 = arith.constant dense<0.000000e+00> : vector<16x256xf32>
    %55 = tpu.matmul %49, %52, %cst_38 {dimension_numbers = #tpu.dot_dimension_numbers<[1], [0], [0], [1], [0, 0, 1, 1], [], []>} : vector<16x128xf32>, vector<128x256xf32>, vector<16x256xf32> -> vector<16x256xf32>
    %cst_39 = arith.constant dense<0.000000e+00> : vector<16x256xf32>
    %56 = tpu.matmul %50, %52, %cst_39 {dimension_numbers = #tpu.dot_dimension_numbers<[1], [0], [0], [1], [0, 0, 1, 1], [], []>} : vector<16x128xf32>, vector<128x256xf32>, vector<16x256xf32> -> vector<16x256xf32>
    %57 = arith.addf %55, %56 : vector<16x256xf32>
    %cst_40 = arith.constant dense<0.000000e+00> : vector<16x256xf32>
    %58 = tpu.matmul %49, %54, %cst_40 {dimension_numbers = #tpu.dot_dimension_numbers<[1], [0], [0], [1], [0, 0, 1, 1], [], []>} : vector<16x128xf32>, vector<128x256xf32>, vector<16x256xf32> -> vector<16x256xf32>
    %59 = arith.addf %57, %58 : vector<16x256xf32>
    %c0_41 = arith.constant 0 : index
    %c0_42 = arith.constant 0 : index
    %c0_43 = arith.constant 0 : index
    %60 = vector.load %arg7[%c0_41, %c0_42, %c0_43] : memref<2x128x256xf32, #tpu.memory_space<vmem>>, vector<1x128x256xf32>
    %61 = vector.shape_cast %60 : vector<1x128x256xf32> to vector<128x256xf32>
    %c1_44 = arith.constant 1 : index
    %c0_45 = arith.constant 0 : index
    %c0_46 = arith.constant 0 : index
    %62 = vector.load %arg7[%c1_44, %c0_45, %c0_46] : memref<2x128x256xf32, #tpu.memory_space<vmem>>, vector<1x128x256xf32>
    %63 = vector.shape_cast %62 : vector<1x128x256xf32> to vector<128x256xf32>
    %cst_47 = arith.constant dense<0.000000e+00> : vector<16x256xf32>
    %64 = tpu.matmul %47, %61, %cst_47 {dimension_numbers = #tpu.dot_dimension_numbers<[1], [0], [0], [1], [0, 0, 1, 1], [], []>} : vector<16x128xf32>, vector<128x256xf32>, vector<16x256xf32> -> vector<16x256xf32>
    %cst_48 = arith.constant dense<0.000000e+00> : vector<16x256xf32>
    %65 = tpu.matmul %48, %61, %cst_48 {dimension_numbers = #tpu.dot_dimension_numbers<[1], [0], [0], [1], [0, 0, 1, 1], [], []>} : vector<16x128xf32>, vector<128x256xf32>, vector<16x256xf32> -> vector<16x256xf32>
    %66 = arith.addf %64, %65 : vector<16x256xf32>
    %cst_49 = arith.constant dense<0.000000e+00> : vector<16x256xf32>
    %67 = tpu.matmul %47, %63, %cst_49 {dimension_numbers = #tpu.dot_dimension_numbers<[1], [0], [0], [1], [0, 0, 1, 1], [], []>} : vector<16x128xf32>, vector<128x256xf32>, vector<16x256xf32> -> vector<16x256xf32>
    %68 = arith.addf %66, %67 : vector<16x256xf32>
    %69 = arith.addf %59, %68 : vector<16x256xf32>
    %c0_50 = arith.constant 0 : index
    %c0_51 = arith.constant 0 : index
    %70 = vector.load %arg8[%c0_50, %c0_51] : memref<1x256xf32, #tpu.memory_space<vmem>>, vector<1x256xf32>
    %71 = vector.broadcast %70 : vector<1x256xf32> to vector<16x256xf32>
    %72 = arith.addf %69, %71 : vector<16x256xf32>
    %73 = vector.extract_strided_slice %72 {offsets = [0, 0], sizes = [16, 128], strides = [1, 1]} : vector<16x256xf32> to vector<16x128xf32>
    %74 = vector.extract_strided_slice %72 {offsets = [0, 128], sizes = [16, 128], strides = [1, 1]} : vector<16x256xf32> to vector<16x128xf32>
    %cst_52 = arith.constant 0.000000e+00 : f32
    %75 = vector.broadcast %cst_52 : f32 to vector<16x128xf32>
    %76 = arith.subf %75, %74 : vector<16x128xf32>
    %77 = math.exp %76 : vector<16x128xf32>
    %cst_53 = arith.constant 1.000000e+00 : f32
    %78 = vector.broadcast %cst_53 : f32 to vector<16x128xf32>
    %79 = arith.addf %78, %77 : vector<16x128xf32>
    %cst_54 = arith.constant 1.000000e+00 : f32
    %80 = vector.broadcast %cst_54 : f32 to vector<16x128xf32>
    %81 = arith.divf %80, %79 : vector<16x128xf32>
    %82 = arith.mulf %73, %81 : vector<16x128xf32>
    %83 = arith.addf %1, %82 : vector<16x128xf32>
    %c0_55 = arith.constant 0 : index
    %c0_56 = arith.constant 0 : index
    %c0_57 = arith.constant 0 : index
    %84 = vector.load %arg9[%c0_55, %c0_56, %c0_57] : memref<1x16x128xf32, #tpu.memory_space<vmem>>, vector<1x16x128xf32>
    %85 = vector.shape_cast %84 : vector<1x16x128xf32> to vector<16x128xf32>
    %86 = vector.shape_cast %83 : vector<16x128xf32> to vector<1x16x128xf32>
    tpu.vector_store %arg9[%c0_55, %c0_56, %c0_57], %86 {strides = array<i32>} : memref<1x16x128xf32, #tpu.memory_space<vmem>>, vector<1x16x128xf32>,
    return
  }
  func.func @transform_0(%arg0: i32) -> (i32, i32, i32) {
    %c0_i32 = arith.constant 0 : i32
    %c0_i32_0 = arith.constant 0 : i32
    %c0_i32_1 = arith.constant 0 : i32
    return %arg0, %c0_i32, %c0_i32_0 : i32, i32, i32
  }
  func.func @transform_1(%arg0: i32) -> (i32, i32) {
    %c0_i32 = arith.constant 0 : i32
    %c0_i32_0 = arith.constant 0 : i32
    %c0_i32_1 = arith.constant 0 : i32
    return %c0_i32, %c0_i32_0 : i32, i32
  }
  func.func @transform_2(%arg0: i32) -> (i32, i32, i32) {
    %c0_i32 = arith.constant 0 : i32
    %c0_i32_0 = arith.constant 0 : i32
    %c0_i32_1 = arith.constant 0 : i32
    %c0_i32_2 = arith.constant 0 : i32
    return %c0_i32, %c0_i32_0, %c0_i32_1 : i32, i32, i32
  }
  func.func @transform_3(%arg0: i32) -> (i32, i32, i32) {
    %c0_i32 = arith.constant 0 : i32
    %c0_i32_0 = arith.constant 0 : i32
    %c0_i32_1 = arith.constant 0 : i32
    %c0_i32_2 = arith.constant 0 : i32
    return %c0_i32, %c0_i32_0, %c0_i32_1 : i32, i32, i32
  }
  func.func @transform_4(%arg0: i32) -> (i32, i32) {
    %c0_i32 = arith.constant 0 : i32
    %c0_i32_0 = arith.constant 0 : i32
    %c0_i32_1 = arith.constant 0 : i32
    return %c0_i32, %c0_i32_0 : i32, i32
  }
  func.func @transform_5(%arg0: i32) -> (i32, i32, i32) {
    %c0_i32 = arith.constant 0 : i32
    %c0_i32_0 = arith.constant 0 : i32
    %c0_i32_1 = arith.constant 0 : i32
    %c0_i32_2 = arith.constant 0 : i32
    return %c0_i32, %c0_i32_0, %c0_i32_1 : i32, i32, i32
  }
  func.func @transform_6(%arg0: i32) -> (i32, i32, i32) {
    %c0_i32 = arith.constant 0 : i32
    %c0_i32_0 = arith.constant 0 : i32
    %c0_i32_1 = arith.constant 0 : i32
    %c0_i32_2 = arith.constant 0 : i32
    return %c0_i32, %c0_i32_0, %c0_i32_1 : i32, i32, i32
  }
  func.func @transform_7(%arg0: i32) -> (i32, i32) {
    %c0_i32 = arith.constant 0 : i32
    %c0_i32_0 = arith.constant 0 : i32
    %c0_i32_1 = arith.constant 0 : i32
    return %c0_i32, %c0_i32_0 : i32, i32
  }
  func.func @transform_8(%arg0: i32) -> (i32, i32, i32) {
    %c0_i32 = arith.constant 0 : i32
    %c0_i32_0 = arith.constant 0 : i32
    %c0_i32_1 = arith.constant 0 : i32
    return %arg0, %c0_i32, %c0_i32_0 : i32, i32, i32
  }
}

</mosaic_0001>

<bundles_post_ra>
// kernel: tile.23
= control target key start
LH: loop header
LB: loop body
LE: loop exit
PB: predicated region body
PF: predicated region fallthrough
CT: control target
= control target key end

     0   :  { %s40_s0 = inlined_call_operand.vmem [shape: f32[4], index: 0, kind: input, shape index: {}]   ;;  %s41_s1 = inlined_call_operand.vmem [shape: f32[32,4], index: 1, kind: output, shape index: {}]  }
   0x1   :  { %v4_v0 = vld [vmem:[%s40_s0] ss:$0 sm:$0xff] }
   0x2   :  { %5 = vst [vmem:[%s41_s1] sm:$0xff] %v4_v0  ;;  %12 = vst [vmem:[%s41_s1 + $0x8] sm:$0xff] %v4_v0 }
   0x3   :  { %13 = vst [vmem:[%s41_s1 + $0x10] sm:$0xff] %v4_v0  ;;  %14 = vst [vmem:[%s41_s1 + $0x18] sm:$0xff] %v4_v0 }

// kernel: tile.24
= control target key start
LH: loop header
LB: loop body
LE: loop exit
PB: predicated region body
PF: predicated region fallthrough
CT: control target
= control target key end

     0   :  { %s259_s10 = smov 124   ;;  %s260_s11 = smov 116   ;;  %vm3_vm0 = vcmask 31744   ;;  %vm9_vm1 = vcmask 1048544   ;;  %vm15_vm2 = vcmask 1015744   ;;  %vm21_vm3 = vcmask 982944   ;;  %s399_s0 = inlined_call_operand.vmem [shape: f32[32,4], index: 0, kind: input, shape index: {}]   ;;  %s400_s1 = inlined_call_operand.vmem [shape: f32[128], index: 1, kind: output, shape index: {}]  }
   0x1   :  { %v197_v0 = vld [vmem:[%s399_s0 + $0x1f] sm:$0x1]   ;;  %v199_v1 = vld [vmem:[%s399_s0 + $0x1d] sm:$0x1]   ;;  %v198_v2 = vld [vmem:[%s399_s0 + $0x1e] sm:$0x1]  }
   0x2   :  { %7 = vrot.lane.b32.xlu0 %v197_v0, %s259_s10  ;;  %19 = vrot.lane.b32.xlu1 %v199_v1, %s260_s11  ;;  %v200_v3 = vld [vmem:[%s399_s0 + $0x1c] sm:$0x1]   ;;  %s261_s16 = smov 120   ;;  %s262_s17 = smov 112   ;;  %v201_v4 = vld [vmem:[%s399_s0 + $0x1b] sm:$0x1]  }
   0x3   :  { %v202_v5 = vld [vmem:[%s399_s0 + $0x1a] sm:$0x1]   ;;  %s263_s22 = smov 108   ;;  %s264_s23 = smov 104   ;;  %v203_v6 = vld [vmem:[%s399_s0 + $0x19] sm:$0x1]  }
   0x4   :  { %v204_v7 = vld [vmem:[%s399_s0 + $0x18] sm:$0x1]   ;;  %s265_s28 = smov 100   ;;  %s266_s29 = smov 96   ;;  %v205_v8 = vld [vmem:[%s399_s0 + $0x17] sm:$0x1]  }
   0x5   :  { %v206_v9 = vld [vmem:[%s399_s0 + $0x16] sm:$0x1]   ;;  %v2_v10 = vld [vmem:[%s399_s0] sm:$0x1]   ;;  %s267_s7 = smov 92   ;;  %s268_s8 = smov 88  }
   0x6   :  { %13 = vrot.lane.b32.xlu0 %v198_v2, %s261_s16  ;;  %25 = vrot.lane.b32.xlu1 %v200_v3, %s262_s17  ;;  %4 = vst.msk [vmem:[#allocation0] sm:$0x1] %vm3_vm0, %v2_v10   ;;  %v207_v11 = vld [vmem:[%s399_s0 + $0x15] sm:$0x1]   ;;  %v208_v12 = vld [vmem:[%s399_s0 + $0x14] sm:$0x1]  }
   0x7   :  { %s269_s13 = smov 84   ;;  %s270_s14 = smov 80   ;;  %v209_v13 = vld [vmem:[%s399_s0 + $0x13] sm:$0x1]   ;;  %v210_v14 = vld [vmem:[%s399_s0 + $0x12] sm:$0x1]  }
   0x8   :  { %s271_s19 = smov 76   ;;  %s272_s20 = smov 72   ;;  %v211_v15 = vld [vmem:[%s399_s0 + $0x11] sm:$0x1]   ;;  %v212_v16 = vld [vmem:[%s399_s0 + $0x10] sm:$0x1]  }
   0x9   :  { %s273_s25 = smov 68   ;;  %s274_s26 = smov 64   ;;  %v213_v17 = vld [vmem:[%s399_s0 + $0xf] sm:$0x1]   ;;  %v214_v18 = vld [vmem:[%s399_s0 + $0xe] sm:$0x1]  }
   0xa   :  { %31 = vrot.lane.b32.xlu0 %v201_v4, %s263_s22  ;;  %37 = vrot.lane.b32.xlu1 %v202_v5, %s264_s23  ;;  %s275_s2 = smov 60   ;;  %s276_s3 = smov 56   ;;  %v215_v19 = vld [vmem:[%s399_s0 + $0xd] sm:$0x1]   ;;  %v216_v20 = vld [vmem:[%s399_s0 + $0xc] sm:$0x1]  }
   0xb   :  { %s278_s9 = smov 48   ;;  %v217_v21 = vld [vmem:[%s399_s0 + $0xb] sm:$0x1]   ;;  %v218_v22 = vld [vmem:[%s399_s0 + $0xa] sm:$0x1]   ;;  %s280_s15 = smov 40  }
   0xc   :  { %v219_v23 = vld [vmem:[%s399_s0 + $0x9] sm:$0x1]   ;;  %v220_v24 = vld [vmem:[%s399_s0 + $0x8] sm:$0x1]   ;;  %s282_s21 = smov 32   ;;  %s284_s27 = smov 24  }
   0xd   :  { %v221_v25 = vld [vmem:[%s399_s0 + $0x7] sm:$0x1]   ;;  %v222_v26 = vld [vmem:[%s399_s0 + $0x6] sm:$0x1]   ;;  %v223_v27 = vld [vmem:[%s399_s0 + $0x5] sm:$0x1]  }
   0xe   :  { %43 = vrot.lane.b32.xlu0 %v203_v6, %s265_s28  ;;  %49 = vrot.lane.b32.xlu1 %v204_v7, %s266_s29  ;;  %v224_v28 = vld [vmem:[%s399_s0 + $0x4] sm:$0x1]   ;;  %s286_s4 = smov 16   ;;  %v225_v29 = vld [vmem:[%s399_s0 + $0x3] sm:$0x1]   ;;  %s288_s10 = smov 8  }
   0xf   :  { %v226_v30 = vld [vmem:[%s399_s0 + $0x2] sm:$0x1]   ;;  %v227_v31 = vld [vmem:[%s399_s0 + $0x1] sm:$0x1]   ;;  %s289_s0 = smov 4   ;;  %vm27_vm4 = vcmask 950144  }
  0x10   :  { %vm33_vm5 = vcmask 917344   ;;  %vm39_vm6 = vcmask 884544   ;;  %vm45_vm7 = vcmask 851744   ;;  %vm51_vm8 = vcmask 818944  }
  0x11   :  { %vm57_vm9 = vcmask 786144   ;;  %vm63_vm10 = vcmask 753344   ;;  %vm69_vm11 = vcmask 720544   ;;  %vm75_vm12 = vcmask 687744  }
  0x12   :  { %55 = vrot.lane.b32.xlu0 %v205_v8, %s267_s7  ;;  %61 = vrot.lane.b32.xlu1 %v206_v9, %s268_s8  ;;  %s277_s8 = smov 52   ;;  %vm81_vm13 = vcmask 654944   ;;  %vm87_vm14 = vcmask 622144   ;;  %vm93_vm15 = vcmask 589344   ;;  %vm99_vm0 = vcmask 556544  }
  0x16   :  { %67 = vrot.lane.b32.xlu0 %v207_v11, %s269_s13  ;;  %73 = vrot.lane.b32.xlu1 %v208_v12, %s270_s14  ;;  %s279_s14 = smov 44  }
  0x1a   :  { %79 = vrot.lane.b32.xlu0 %v209_v13, %s271_s19  ;;  %85 = vrot.lane.b32.xlu1 %v210_v14, %s272_s20  ;;  %s281_s20 = smov 36  }
  0x1e   :  { %91 = vrot.lane.b32.xlu0 %v211_v15, %s273_s25  ;;  %97 = vrot.lane.b32.xlu1 %v212_v16, %s274_s26  ;;  %s283_s26 = smov 28  }
  0x22   :  { %103 = vrot.lane.b32.xlu0 %v213_v17, %s275_s2  ;;  %109 = vrot.lane.b32.xlu1 %v214_v18, %s276_s3  ;;  %s285_s3 = smov 20  }
  0x26   :  { %115 = vrot.lane.b32.xlu0 %v215_v19, %s277_s8  ;;  %121 = vrot.lane.b32.xlu1 %v216_v20, %s278_s9  ;;  %s287_s9 = smov 12  }
  0x2a   :  { %127 = vrot.lane.b32.xlu0 %v217_v21, %s279_s14  ;;  %133 = vrot.lane.b32.xlu1 %v218_v22, %s280_s15 }
  0x2e   :  { %139 = vrot.lane.b32.xlu0 %v219_v23, %s281_s20  ;;  %145 = vrot.lane.b32.xlu1 %v220_v24, %s282_s21 }
  0x32   :  { %151 = vrot.lane.b32.xlu0 %v221_v25, %s283_s26  ;;  %157 = vrot.lane.b32.xlu1 %v222_v26, %s284_s27 }
  0x36   :  { %163 = vrot.lane.b32.xlu0 %v223_v27, %s285_s3  ;;  %169 = vrot.lane.b32.xlu1 %v224_v28, %s286_s4 }
  0x3a   :  { %175 = vrot.lane.b32.xlu0 %v225_v29, %s287_s9  ;;  %181 = vrot.lane.b32.xlu1 %v226_v30, %s288_s10 }
  0x3e   :  { %187 = vrot.lane.b32.xlu0 %v227_v31, %s289_s0 }
  0x74   :  { %v8_v32 = vpop.permute.xlu0 %7   ;;  %v20_v33 = vpop.permute.xlu1 %19  }
  0x75   :  { %10 = vst.msk [vmem:[#allocation0] sm:$0x1] %vm9_vm1, %v8_v32   ;;  %vm105_vm1 = vcmask 523744  }
  0x78   :  { %v14_v34 = vpop.permute.xlu0 %13   ;;  %v26_v35 = vpop.permute.xlu1 %25  }
  0x79   :  { %16 = vst.msk [vmem:[#allocation0] sm:$0x1] %vm15_vm2, %v14_v34   ;;  %vm111_vm2 = vcmask 490944  }
  0x7a   :  { %22 = vst.msk [vmem:[#allocation0] sm:$0x1] %vm21_vm3, %v20_v33   ;;  %vm117_vm3 = vcmask 458144  }
  0x7b   :  { %28 = vst.msk [vmem:[#allocation0] sm:$0x1] %vm27_vm4, %v26_v35   ;;  %vm123_vm4 = vcmask 425344  }
  0x7c   :  { %v32_v36 = vpop.permute.xlu0 %31   ;;  %v38_v37 = vpop.permute.xlu1 %37  }
  0x7d   :  { %34 = vst.msk [vmem:[#allocation0] sm:$0x1] %vm33_vm5, %v32_v36   ;;  %vm129_vm5 = vcmask 392544  }
  0x7e   :  { %40 = vst.msk [vmem:[#allocation0] sm:$0x1] %vm39_vm6, %v38_v37   ;;  %vm135_vm6 = vcmask 359744  }
  0x80   :  { %v44_v38 = vpop.permute.xlu0 %43   ;;  %v50_v39 = vpop.permute.xlu1 %49  }
  0x81   :  { %46 = vst.msk [vmem:[#allocation0] sm:$0x1] %vm45_vm7, %v44_v38   ;;  %vm141_vm7 = vcmask 326944  }
  0x82   :  { %52 = vst.msk [vmem:[#allocation0] sm:$0x1] %vm51_vm8, %v50_v39   ;;  %vm147_vm8 = vcmask 294144  }
  0x84   :  { %v56_v40 = vpop.permute.xlu0 %55   ;;  %v62_v41 = vpop.permute.xlu1 %61  }
  0x85   :  { %58 = vst.msk [vmem:[#allocation0] sm:$0x1] %vm57_vm9, %v56_v40   ;;  %vm153_vm9 = vcmask 261344  }
  0x86   :  { %64 = vst.msk [vmem:[#allocation0] sm:$0x1] %vm63_vm10, %v62_v41   ;;  %vm159_vm10 = vcmask 228544  }
  0x88   :  { %v68_v42 = vpop.permute.xlu0 %67   ;;  %v74_v43 = vpop.permute.xlu1 %73  }
  0x89   :  { %70 = vst.msk [vmem:[#allocation0] sm:$0x1] %vm69_vm11, %v68_v42   ;;  %vm165_vm11 = vcmask 195744  }
  0x8a   :  { %76 = vst.msk [vmem:[#allocation0] sm:$0x1] %vm75_vm12, %v74_v43   ;;  %vm171_vm12 = vcmask 162944  }
  0x8c   :  { %v80_v44 = vpop.permute.xlu0 %79   ;;  %v86_v45 = vpop.permute.xlu1 %85  }
  0x8d   :  { %82 = vst.msk [vmem:[#allocation0] sm:$0x1] %vm81_vm13, %v80_v44   ;;  %vm177_vm13 = vcmask 130144  }
  0x8e   :  { %88 = vst.msk [vmem:[#allocation0] sm:$0x1] %vm87_vm14, %v86_v45   ;;  %vm183_vm14 = vcmask 97344  }
  0x90   :  { %v92_v46 = vpop.permute.xlu0 %91   ;;  %v98_v47 = vpop.permute.xlu1 %97  }
  0x91   :  { %94 = vst.msk [vmem:[#allocation0] sm:$0x1] %vm93_vm15, %v92_v46   ;;  %vm189_vm15 = vcmask 64544  }
  0x92   :  { %100 = vst.msk [vmem:[#allocation0] sm:$0x1] %vm99_vm0, %v98_v47  }
  0x94   :  { %v104_v48 = vpop.permute.xlu0 %103   ;;  %v110_v49 = vpop.permute.xlu1 %109  }
  0x95   :  { %106 = vst.msk [vmem:[#allocation0] sm:$0x1] %vm105_vm1, %v104_v48  }
  0x96   :  { %112 = vst.msk [vmem:[#allocation0] sm:$0x1] %vm111_vm2, %v110_v49  }
  0x98   :  { %v116_v50 = vpop.permute.xlu0 %115   ;;  %v122_v51 = vpop.permute.xlu1 %121  }
  0x99   :  { %118 = vst.msk [vmem:[#allocation0] sm:$0x1] %vm117_vm3, %v116_v50  }
  0x9a   :  { %124 = vst.msk [vmem:[#allocation0] sm:$0x1] %vm123_vm4, %v122_v51  }
  0x9c   :  { %v128_v52 = vpop.permute.xlu0 %127   ;;  %v134_v53 = vpop.permute.xlu1 %133  }
  0x9d   :  { %130 = vst.msk [vmem:[#allocation0] sm:$0x1] %vm129_vm5, %v128_v52  }
  0x9e   :  { %136 = vst.msk [vmem:[#allocation0] sm:$0x1] %vm135_vm6, %v134_v53  }
  0xa0   :  { %v140_v54 = vpop.permute.xlu0 %139   ;;  %v146_v55 = vpop.permute.xlu1 %145  }
  0xa1   :  { %142 = vst.msk [vmem:[#allocation0] sm:$0x1] %vm141_vm7, %v140_v54  }
  0xa2   :  { %148 = vst.msk [vmem:[#allocation0] sm:$0x1] %vm147_vm8, %v146_v55  }
  0xa4   :  { %v152_v56 = vpop.permute.xlu0 %151   ;;  %v158_v57 = vpop.permute.xlu1 %157  }
  0xa5   :  { %154 = vst.msk [vmem:[#allocation0] sm:$0x1] %vm153_vm9, %v152_v56  }
  0xa6   :  { %160 = vst.msk [vmem:[#allocation0] sm:$0x1] %vm159_vm10, %v158_v57  }
  0xa8   :  { %v164_v58 = vpop.permute.xlu0 %163   ;;  %v170_v59 = vpop.permute.xlu1 %169  }
  0xa9   :  { %166 = vst.msk [vmem:[#allocation0] sm:$0x1] %vm165_vm11, %v164_v58  }
  0xaa   :  { %172 = vst.msk [vmem:[#allocation0] sm:$0x1] %vm171_vm12, %v170_v59  }
  0xac   :  { %v176_v60 = vpop.permute.xlu0 %175   ;;  %v182_v61 = vpop.permute.xlu1 %181  }
  0xad   :  { %178 = vst.msk [vmem:[#allocation0] sm:$0x1] %vm177_vm13, %v176_v60  }
  0xae   :  { %184 = vst.msk [vmem:[#allocation0] sm:$0x1] %vm183_vm14, %v182_v61  }
  0xb0   :  { %v188_v62 = vpop.permute.xlu0 %187  }
  0xb1   :  { %190 = vst.msk [vmem:[#allocation0] sm:$0x1] %vm189_vm15, %v188_v62  }
  0xb8   :  { %v194_v63 = vld [vmem:[#allocation0] sm:$0x1] }
  0xb9   :  { %196 = vst [vmem:[%s400_s1] sm:$0x1] %v194_v63 }

// kernel: tile.19
= control target key start
LH: loop header
LB: loop body
LE: loop exit
PB: predicated region body
PF: predicated region fallthrough
CT: control target
= control target key end

     0   :  { %s259_s10 = smov 124   ;;  %s260_s11 = smov 116   ;;  %vm3_vm0 = vcmask 31744   ;;  %vm9_vm1 = vcmask 1048544   ;;  %vm15_vm2 = vcmask 1015744   ;;  %vm21_vm3 = vcmask 982944   ;;  %s399_s0 = inlined_call_operand.vmem [shape: f32[32,4], index: 0, kind: input, shape index: {}]   ;;  %s400_s1 = inlined_call_operand.vmem [shape: f32[1,128], index: 1, kind: output, shape index: {}]  }
   0x1   :  { %v197_v0 = vld [vmem:[%s399_s0 + $0x1f] sm:$0x1]   ;;  %v199_v1 = vld [vmem:[%s399_s0 + $0x1d] sm:$0x1]   ;;  %v198_v2 = vld [vmem:[%s399_s0 + $0x1e] sm:$0x1]  }
   0x2   :  { %7 = vrot.lane.b32.xlu0 %v197_v0, %s259_s10  ;;  %19 = vrot.lane.b32.xlu1 %v199_v1, %s260_s11  ;;  %v200_v3 = vld [vmem:[%s399_s0 + $0x1c] sm:$0x1]   ;;  %s261_s16 = smov 120   ;;  %s262_s17 = smov 112   ;;  %v201_v4 = vld [vmem:[%s399_s0 + $0x1b] sm:$0x1]  }
   0x3   :  { %v202_v5 = vld [vmem:[%s399_s0 + $0x1a] sm:$0x1]   ;;  %s263_s22 = smov 108   ;;  %s264_s23 = smov 104   ;;  %v203_v6 = vld [vmem:[%s399_s0 + $0x19] sm:$0x1]  }
   0x4   :  { %v204_v7 = vld [vmem:[%s399_s0 + $0x18] sm:$0x1]   ;;  %s265_s28 = smov 100   ;;  %s266_s29 = smov 96   ;;  %v205_v8 = vld [vmem:[%s399_s0 + $0x17] sm:$0x1]  }
   0x5   :  { %v206_v9 = vld [vmem:[%s399_s0 + $0x16] sm:$0x1]   ;;  %v2_v10 = vld [vmem:[%s399_s0] sm:$0x1]   ;;  %s267_s7 = smov 92   ;;  %s268_s8 = smov 88  }
   0x6   :  { %13 = vrot.lane.b32.xlu0 %v198_v2, %s261_s16  ;;  %25 = vrot.lane.b32.xlu1 %v200_v3, %s262_s17  ;;  %4 = vst.msk [vmem:[#allocation0] sm:$0x1] %vm3_vm0, %v2_v10   ;;  %v207_v11 = vld [vmem:[%s399_s0 + $0x15] sm:$0x1]   ;;  %v208_v12 = vld [vmem:[%s399_s0 + $0x14] sm:$0x1]  }
   0x7   :  { %s269_s13 = smov 84   ;;  %s270_s14 = smov 80   ;;  %v209_v13 = vld [vmem:[%s399_s0 + $0x13] sm:$0x1]   ;;  %v210_v14 = vld [vmem:[%s399_s0 + $0x12] sm:$0x1]  }
   0x8   :  { %s271_s19 = smov 76   ;;  %s272_s20 = smov 72   ;;  %v211_v15 = vld [vmem:[%s399_s0 + $0x11] sm:$0x1]   ;;  %v212_v16 = vld [vmem:[%s399_s0 + $0x10] sm:$0x1]  }
   0x9   :  { %s273_s25 = smov 68   ;;  %s274_s26 = smov 64   ;;  %v213_v17 = vld [vmem:[%s399_s0 + $0xf] sm:$0x1]   ;;  %v214_v18 = vld [vmem:[%s399_s0 + $0xe] sm:$0x1]  }
   0xa   :  { %31 = vrot.lane.b32.xlu0 %v201_v4, %s263_s22  ;;  %37 = vrot.lane.b32.xlu1 %v202_v5, %s264_s23  ;;  %s275_s2 = smov 60   ;;  %s276_s3 = smov 56   ;;  %v215_v19 = vld [vmem:[%s399_s0 + $0xd] sm:$0x1]   ;;  %v216_v20 = vld [vmem:[%s399_s0 + $0xc] sm:$0x1]  }
   0xb   :  { %s278_s9 = smov 48   ;;  %v217_v21 = vld [vmem:[%s399_s0 + $0xb] sm:$0x1]   ;;  %v218_v22 = vld [vmem:[%s399_s0 + $0xa] sm:$0x1]   ;;  %s280_s15 = smov 40  }
   0xc   :  { %v219_v23 = vld [vmem:[%s399_s0 + $0x9] sm:$0x1]   ;;  %v220_v24 = vld [vmem:[%s399_s0 + $0x8] sm:$0x1]   ;;  %s282_s21 = smov 32   ;;  %s284_s27 = smov 24  }
   0xd   :  { %v221_v25 = vld [vmem:[%s399_s0 + $0x7] sm:$0x1]   ;;  %v222_v26 = vld [vmem:[%s399_s0 + $0x6] sm:$0x1]   ;;  %v223_v27 = vld [vmem:[%s399_s0 + $0x5] sm:$0x1]  }
   0xe   :  { %43 = vrot.lane.b32.xlu0 %v203_v6, %s265_s28  ;;  %49 = vrot.lane.b32.xlu1 %v204_v7, %s266_s29  ;;  %v224_v28 = vld [vmem:[%s399_s0 + $0x4] sm:$0x1]   ;;  %s286_s4 = smov 16   ;;  %v225_v29 = vld [vmem:[%s399_s0 + $0x3] sm:$0x1]   ;;  %s288_s10 = smov 8  }
   0xf   :  { %v226_v30 = vld [vmem:[%s399_s0 + $0x2] sm:$0x1]   ;;  %v227_v31 = vld [vmem:[%s399_s0 + $0x1] sm:$0x1]   ;;  %s289_s0 = smov 4   ;;  %vm27_vm4 = vcmask 950144  }
  0x10   :  { %vm33_vm5 = vcmask 917344   ;;  %vm39_vm6 = vcmask 884544   ;;  %vm45_vm7 = vcmask 851744   ;;  %vm51_vm8 = vcmask 818944  }
  0x11   :  { %vm57_vm9 = vcmask 786144   ;;  %vm63_vm10 = vcmask 753344   ;;  %vm69_vm11 = vcmask 720544   ;;  %vm75_vm12 = vcmask 687744  }
  0x12   :  { %55 = vrot.lane.b32.xlu0 %v205_v8, %s267_s7  ;;  %61 = vrot.lane.b32.xlu1 %v206_v9, %s268_s8  ;;  %s277_s8 = smov 52   ;;  %vm81_vm13 = vcmask 654944   ;;  %vm87_vm14 = vcmask 622144   ;;  %vm93_vm15 = vcmask 589344   ;;  %vm99_vm0 = vcmask 556544  }
  0x16   :  { %67 = vrot.lane.b32.xlu0 %v207_v11, %s269_s13  ;;  %73 = vrot.lane.b32.xlu1 %v208_v12, %s270_s14  ;;  %s279_s14 = smov 44  }
  0x1a   :  { %79 = vrot.lane.b32.xlu0 %v209_v13, %s271_s19  ;;  %85 = vrot.lane.b32.xlu1 %v210_v14, %s272_s20  ;;  %s281_s20 = smov 36  }
  0x1e   :  { %91 = vrot.lane.b32.xlu0 %v211_v15, %s273_s25  ;;  %97 = vrot.lane.b32.xlu1 %v212_v16, %s274_s26  ;;  %s283_s26 = smov 28  }
  0x22   :  { %103 = vrot.lane.b32.xlu0 %v213_v17, %s275_s2  ;;  %109 = vrot.lane.b32.xlu1 %v214_v18, %s276_s3  ;;  %s285_s3 = smov 20  }
  0x26   :  { %115 = vrot.lane.b32.xlu0 %v215_v19, %s277_s8  ;;  %121 = vrot.lane.b32.xlu1 %v216_v20, %s278_s9  ;;  %s287_s9 = smov 12  }
  0x2a   :  { %127 = vrot.lane.b32.xlu0 %v217_v21, %s279_s14  ;;  %133 = vrot.lane.b32.xlu1 %v218_v22, %s280_s15 }
  0x2e   :  { %139 = vrot.lane.b32.xlu0 %v219_v23, %s281_s20  ;;  %145 = vrot.lane.b32.xlu1 %v220_v24, %s282_s21 }
  0x32   :  { %151 = vrot.lane.b32.xlu0 %v221_v25, %s283_s26  ;;  %157 = vrot.lane.b32.xlu1 %v222_v26, %s284_s27 }
  0x36   :  { %163 = vrot.lane.b32.xlu0 %v223_v27, %s285_s3  ;;  %169 = vrot.lane.b32.xlu1 %v224_v28, %s286_s4 }
  0x3a   :  { %175 = vrot.lane.b32.xlu0 %v225_v29, %s287_s9  ;;  %181 = vrot.lane.b32.xlu1 %v226_v30, %s288_s10 }
  0x3e   :  { %187 = vrot.lane.b32.xlu0 %v227_v31, %s289_s0 }
  0x74   :  { %v8_v32 = vpop.permute.xlu0 %7   ;;  %v20_v33 = vpop.permute.xlu1 %19  }
  0x75   :  { %10 = vst.msk [vmem:[#allocation0] sm:$0x1] %vm9_vm1, %v8_v32   ;;  %vm105_vm1 = vcmask 523744  }
  0x78   :  { %v14_v34 = vpop.permute.xlu0 %13   ;;  %v26_v35 = vpop.permute.xlu1 %25  }
  0x79   :  { %16 = vst.msk [vmem:[#allocation0] sm:$0x1] %vm15_vm2, %v14_v34   ;;  %vm111_vm2 = vcmask 490944  }
  0x7a   :  { %22 = vst.msk [vmem:[#allocation0] sm:$0x1] %vm21_vm3, %v20_v33   ;;  %vm117_vm3 = vcmask 458144  }
  0x7b   :  { %28 = vst.msk [vmem:[#allocation0] sm:$0x1] %vm27_vm4, %v26_v35   ;;  %vm123_vm4 = vcmask 425344  }
  0x7c   :  { %v32_v36 = vpop.permute.xlu0 %31   ;;  %v38_v37 = vpop.permute.xlu1 %37  }
  0x7d   :  { %34 = vst.msk [vmem:[#allocation0] sm:$0x1] %vm33_vm5, %v32_v36   ;;  %vm129_vm5 = vcmask 392544  }
  0x7e   :  { %40 = vst.msk [vmem:[#allocation0] sm:$0x1] %vm39_vm6, %v38_v37   ;;  %vm135_vm6 = vcmask 359744  }
  0x80   :  { %v44_v38 = vpop.permute.xlu0 %43   ;;  %v50_v39 = vpop.permute.xlu1 %49  }
  0x81   :  { %46 = vst.msk [vmem:[#allocation0] sm:$0x1] %vm45_vm7, %v44_v38   ;;  %vm141_vm7 = vcmask 326944  }
  0x82   :  { %52 = vst.msk [vmem:[#allocation0] sm:$0x1] %vm51_vm8, %v50_v39   ;;  %vm147_vm8 = vcmask 294144  }
  0x84   :  { %v56_v40 = vpop.permute.xlu0 %55   ;;  %v62_v41 = vpop.permute.xlu1 %61  }
  0x85   :  { %58 = vst.msk [vmem:[#allocation0] sm:$0x1] %vm57_vm9, %v56_v40   ;;  %vm153_vm9 = vcmask 261344  }
  0x86   :  { %64 = vst.msk [vmem:[#allocation0] sm:$0x1] %vm63_vm10, %v62_v41   ;;  %vm159_vm10 = vcmask 228544  }
  0x88   :  { %v68_v42 = vpop.permute.xlu0 %67   ;;  %v74_v43 = vpop.permute.xlu1 %73  }
  0x89   :  { %70 = vst.msk [vmem:[#allocation0] sm:$0x1] %vm69_vm11, %v68_v42   ;;  %vm165_vm11 = vcmask 195744  }
  0x8a   :  { %76 = vst.msk [vmem:[#allocation0] sm:$0x1] %vm75_vm12, %v74_v43   ;;  %vm171_vm12 = vcmask 162944  }
  0x8c   :  { %v80_v44 = vpop.permute.xlu0 %79   ;;  %v86_v45 = vpop.permute.xlu1 %85  }
  0x8d   :  { %82 = vst.msk [vmem:[#allocation0] sm:$0x1] %vm81_vm13, %v80_v44   ;;  %vm177_vm13 = vcmask 130144  }
  0x8e   :  { %88 = vst.msk [vmem:[#allocation0] sm:$0x1] %vm87_vm14, %v86_v45   ;;  %vm183_vm14 = vcmask 97344  }
  0x90   :  { %v92_v46 = vpop.permute.xlu0 %91   ;;  %v98_v47 = vpop.permute.xlu1 %97  }
  0x91   :  { %94 = vst.msk [vmem:[#allocation0] sm:$0x1] %vm93_vm15, %v92_v46   ;;  %vm189_vm15 = vcmask 64544  }
  0x92   :  { %100 = vst.msk [vmem:[#allocation0] sm:$0x1] %vm99_vm0, %v98_v47  }
  0x94   :  { %v104_v48 = vpop.permute.xlu0 %103   ;;  %v110_v49 = vpop.permute.xlu1 %109  }
  0x95   :  { %106 = vst.msk [vmem:[#allocation0] sm:$0x1] %vm105_vm1, %v104_v48  }
  0x96   :  { %112 = vst.msk [vmem:[#allocation0] sm:$0x1] %vm111_vm2, %v110_v49  }
  0x98   :  { %v116_v50 = vpop.permute.xlu0 %115   ;;  %v122_v51 = vpop.permute.xlu1 %121  }
  0x99   :  { %118 = vst.msk [vmem:[#allocation0] sm:$0x1] %vm117_vm3, %v116_v50  }
  0x9a   :  { %124 = vst.msk [vmem:[#allocation0] sm:$0x1] %vm123_vm4, %v122_v51  }
  0x9c   :  { %v128_v52 = vpop.permute.xlu0 %127   ;;  %v134_v53 = vpop.permute.xlu1 %133  }
  0x9d   :  { %130 = vst.msk [vmem:[#allocation0] sm:$0x1] %vm129_vm5, %v128_v52  }
  0x9e   :  { %136 = vst.msk [vmem:[#allocation0] sm:$0x1] %vm135_vm6, %v134_v53  }
  0xa0   :  { %v140_v54 = vpop.permute.xlu0 %139   ;;  %v146_v55 = vpop.permute.xlu1 %145  }
  0xa1   :  { %142 = vst.msk [vmem:[#allocation0] sm:$0x1] %vm141_vm7, %v140_v54  }
  0xa2   :  { %148 = vst.msk [vmem:[#allocation0] sm:$0x1] %vm147_vm8, %v146_v55  }
  0xa4   :  { %v152_v56 = vpop.permute.xlu0 %151   ;;  %v158_v57 = vpop.permute.xlu1 %157  }
  0xa5   :  { %154 = vst.msk [vmem:[#allocation0] sm:$0x1] %vm153_vm9, %v152_v56  }
  0xa6   :  { %160 = vst.msk [vmem:[#allocation0] sm:$0x1] %vm159_vm10, %v158_v57  }
  0xa8   :  { %v164_v58 = vpop.permute.xlu0 %163   ;;  %v170_v59 = vpop.permute.xlu1 %169  }
  0xa9   :  { %166 = vst.msk [vmem:[#allocation0] sm:$0x1] %vm165_vm11, %v164_v58  }
  0xaa   :  { %172 = vst.msk [vmem:[#allocation0] sm:$0x1] %vm171_vm12, %v170_v59  }
  0xac   :  { %v176_v60 = vpop.permute.xlu0 %175   ;;  %v182_v61 = vpop.permute.xlu1 %181  }
  0xad   :  { %178 = vst.msk [vmem:[#allocation0] sm:$0x1] %vm177_vm13, %v176_v60  }
  0xae   :  { %184 = vst.msk [vmem:[#allocation0] sm:$0x1] %vm183_vm14, %v182_v61  }
  0xb0   :  { %v188_v62 = vpop.permute.xlu0 %187  }
  0xb1   :  { %190 = vst.msk [vmem:[#allocation0] sm:$0x1] %vm189_vm15, %v188_v62  }
  0xb8   :  { %v194_v63 = vld [vmem:[#allocation0] sm:$0x1] }
  0xb9   :  { %196 = vst [vmem:[%s400_s1] sm:$0x1] %v194_v63 }

// kernel: residual_block.1
= control target key start
LH: loop header
LB: loop body
LE: loop exit
PB: predicated region body
PF: predicated region fallthrough
CT: control target
= control target key end

     0   :  { %vm50_vm0 = vcmask 130048   ;;  %s3215_s0 = inlined_call_operand.vmem [shape: f32[1,16,128], index: 0, kind: input, shape index: {}]   ;;  %s3216_s1 = inlined_call_operand.vmem [shape: f32[16,16], index: 1, kind: input, shape index: {}]   ;;  %s3217_s2 = inlined_call_operand.vmem [shape: f32[2,128,128], index: 2, kind: input, shape index: {}]   ;;  %s3218_s3 = inlined_call_operand.vmem [shape: f32[2,128,128], index: 3, kind: input, shape index: {}]   ;;  %s3219_s4 = inlined_call_operand.vmem [shape: f32[1,128], index: 4, kind: input, shape index: {}]   ;;  %s3220_s5 = inlined_call_operand.vmem [shape: f32[2,128,256], index: 5, kind: input, shape index: {}]   ;;  %s3221_s6 = inlined_call_operand.vmem [shape: f32[2,128,256], index: 6, kind: input, shape index: {}]   ;;  %s3222_s7 = inlined_call_operand.vmem [shape: f32[1,256], index: 7, kind: input, shape index: {}]   ;;  %s3223_s8 = inlined_call_operand.vmem [shape: f32[1,16,128], index: 8, kind: output, shape index: {}]  }
   0x1   :  { %v29_v0 = vld [vmem:[%s3215_s0] sm:$0xff]  ;;  %v30_v1 = vld [vmem:[%s3215_s0 + $0x8] sm:$0xff]  ;;  %v209_v23 = vld [vmem:[%s3217_s2 + $0x10] sm:$0xff] }
   0x2   :  { %v2522_v2 = vld [vmem:[%s3216_s1] sm:$0xff]  ;;  %v35_v3 = vmin.f32 %v29_v0, 0.0  ;;  %v36_v4 = vmin.f32 %v30_v1, 0.0  ;;  %vm33_vm1 = vcmp.gt.f32.partialorder %v29_v0, 0.0  ;;  %vm34_vm2 = vcmp.gt.f32.partialorder %v30_v1, 0.0  ;;  %v2535_v16 = vld [vmem:[%s3216_s1 + $0x8] sm:$0xff] }
   0x3   :  { %1784 = vmatprep.mubr.msk.f32.mxu0 %vm50_vm0, %v2522_v2  ;;  %2008 = vmatprep.mubr.msk.f32.mxu1 %vm50_vm0, %v2522_v2  ;;  %v207_v17 = vld [vmem:[%s3217_s2] sm:$0xff]  ;;  %v208_v18 = vld [vmem:[%s3217_s2 + $0x8] sm:$0xff]  ;;  %v210_v24 = vld [vmem:[%s3217_s2 + $0x18] sm:$0xff] }
   0x4   :  { %v37_v5 = vmul.f32 1.442695, %v35_v3  ;;  %v39_v6 = vmul.f32 1.442695, %v36_v4  ;;  %v2026_v22 = vpack.c.bf16 %v208_v18, %v207_v17  ;;  %v2030_v25 = vpack.c.bf16 %v210_v24, %v209_v23  ;;  %v211_v26 = vld [vmem:[%s3217_s2 + $0x20] sm:$0xff]  ;;  %v212_v27 = vld [vmem:[%s3217_s2 + $0x28] sm:$0xff] }
   0x5   :  { %v2034_v28 = vpack.c.bf16 %v212_v27, %v211_v26  ;;  %v213_v29 = vld [vmem:[%s3217_s2 + $0x30] sm:$0xff]  ;;  %v214_v30 = vld [vmem:[%s3217_s2 + $0x38] sm:$0xff]  ;;  %v215_v32 = vld [vmem:[%s3217_s2 + $0x40] sm:$0xff] }
   0x6   :  { %2449 = vpow2.f32 %v37_v5  ;;  %v2038_v31 = vpack.c.bf16 %v214_v30, %v213_v29  ;;  %v216_v33 = vld [vmem:[%s3217_s2 + $0x48] sm:$0xff]  ;;  %v217_v35 = vld [vmem:[%s3217_s2 + $0x50] sm:$0xff]  ;;  %v218_v36 = vld [vmem:[%s3217_s2 + $0x58] sm:$0xff] }
   0x7   :  { %2451 = vpow2.f32 %v39_v6  ;;  %v2042_v34 = vpack.c.bf16 %v216_v33, %v215_v32  ;;  %v2046_v37 = vpack.c.bf16 %v218_v36, %v217_v35  ;;  %v219_v38 = vld [vmem:[%s3217_s2 + $0x60] sm:$0xff]  ;;  %v220_v39 = vld [vmem:[%s3217_s2 + $0x68] sm:$0xff]  ;;  %v221_v41 = vld [vmem:[%s3217_s2 + $0x70] sm:$0xff] }
   0x8   :  { %v2050_v40 = vpack.c.bf16 %v220_v39, %v219_v38  ;;  %v222_v42 = vld [vmem:[%s3217_s2 + $0x78] sm:$0xff]  ;;  %v1553_v48 = vld [vmem:[%s3217_s2 + $0x80] sm:$0xff]  ;;  %v1554_v49 = vld [vmem:[%s3217_s2 + $0x88] sm:$0xff] }
   0x9   :  { %v2054_v43 = vpack.c.bf16 %v222_v42, %v221_v41  ;;  %v2090_v50 = vpack.c.bf16 %v1554_v49, %v1553_v48  ;;  %v1555_v51 = vld [vmem:[%s3217_s2 + $0x90] sm:$0xff]  ;;  %v1556_v52 = vld [vmem:[%s3217_s2 + $0x98] sm:$0xff]  ;;  %v1557_v54 = vld [vmem:[%s3217_s2 + $0xa0] sm:$0xff] }
   0xa   :  { %v2094_v53 = vpack.c.bf16 %v1556_v52, %v1555_v51  ;;  %v1558_v55 = vld [vmem:[%s3217_s2 + $0xa8] sm:$0xff]  ;;  %v1559_v57 = vld [vmem:[%s3217_s2 + $0xb0] sm:$0xff]  ;;  %v1560_v58 = vld [vmem:[%s3217_s2 + $0xb8] sm:$0xff] }
   0xb   :  { %v2098_v56 = vpack.c.bf16 %v1558_v55, %v1557_v54  ;;  %v2102_v59 = vpack.c.bf16 %v1560_v58, %v1559_v57  ;;  %v1561_v60 = vld [vmem:[%s3217_s2 + $0xc0] sm:$0xff]  ;;  %v1562_v61 = vld [vmem:[%s3217_s2 + $0xc8] sm:$0xff]  ;;  %v1563_v63 = vld [vmem:[%s3217_s2 + $0xd0] sm:$0xff] }
   0xc   :  { %v2106_v62 = vpack.c.bf16 %v1562_v61, %v1561_v60  ;;  %v1565_v3 = vld [vmem:[%s3217_s2 + $0xe0] sm:$0xff]  ;;  %v1566_v4 = vld [vmem:[%s3217_s2 + $0xe8] sm:$0xff]  ;;  %v1567_v6 = vld [vmem:[%s3217_s2 + $0xf0] sm:$0xff] }
   0xd   :  { %v2114_v5 = vpack.c.bf16 %v1566_v4, %v1565_v3  ;;  %v471_v18 = vld [vmem:[%s3218_s3 + $0x20] sm:$0xff]  ;;  %v473_v23 = vld [vmem:[%s3218_s3 + $0x30] sm:$0xff]  ;;  %v474_v24 = vld [vmem:[%s3218_s3 + $0x38] sm:$0xff] }
   0xe   :  { %v475_v26 = vld [vmem:[%s3218_s3 + $0x40] sm:$0xff]  ;;  %v478_v29 = vld [vmem:[%s3218_s3 + $0x58] sm:$0xff]  ;;  %v480_v32 = vld [vmem:[%s3218_s3 + $0x68] sm:$0xff] }
   0xf   :  { %v482_v35 = vld [vmem:[%s3218_s3 + $0x78] sm:$0xff]  ;;  %v1571_v39 = vld [vmem:[%s3218_s3 + $0x90] sm:$0xff]  ;;  %v1573_v42 = vld [vmem:[%s3218_s3 + $0xa0] sm:$0xff] }
  0x10   :  { %v2450_v7 = vpop.eup %2449  ;;  %v1577_v48 = vld [vmem:[%s3218_s3 + $0xc0] sm:$0xff]  ;;  %v1580_v51 = vld [vmem:[%s3218_s3 + $0xd8] sm:$0xff]  ;;  %v1582_v54 = vld [vmem:[%s3218_s3 + $0xe8] sm:$0xff] }
  0x11   :  { %v2452_v8 = vpop.eup %2451  ;;  %v1547_v9 = vadd.f32 -1.0, %v2450_v7  ;;  %v1568_v7 = vld [vmem:[%s3217_s2 + $0xf8] sm:$0xff] }
  0x12   :  { %v1548_v10 = vadd.f32 -1.0, %v2452_v8  ;;  %v2118_v8 = vpack.c.bf16 %v1568_v7, %v1567_v6  ;;  %v1584_v57 = vld [vmem:[%s3218_s3 + $0xf8] sm:$0xff] }
  0x13   :  { %v43_v11 = vsel %vm33_vm1, %v29_v0, %v1547_v9  ;;  %v1564_v0 = vld [vmem:[%s3217_s2 + $0xd8] sm:$0xff]  ;;  %v467_v9 = vld [vmem:[%s3218_s3] sm:$0xff] }
  0x14   :  { %v44_v12 = vsel %vm34_vm2, %v30_v1, %v1548_v10  ;;  %v2110_v1 = vpack.c.bf16 %v1564_v0, %v1563_v63  ;;  %v468_v10 = vld [vmem:[%s3218_s3 + $0x8] sm:$0xff] }
  0x15   :  { %v45_v13 = vpack.c.bf16 %v44_v12, %v43_v11 }
  0x17   :  { %2019 = vmatprep.subr.bf16.mxu0 %v45_v13  ;;  %v2528_v14 = vunpack.c.l.bf16 %v45_v13  ;;  %v2530_v15 = vunpack.c.h.bf16 %v45_v13 }
  0x18   :  { %2021 = vmatpush3.bf16.msra.mxu0 %v45_v13  ;;  %v470_v13 = vld [vmem:[%s3218_s3 + $0x18] sm:$0xff] }
  0x19   :  { %v2544_v19 = vsub.f32 %v43_v11, %v2528_v14  ;;  %v2547_v20 = vsub.f32 %v44_v12, %v2530_v15  ;;  %v2122_v11 = vpack.c.bf16 %v468_v10, %v467_v9  ;;  %v469_v12 = vld [vmem:[%s3218_s3 + $0x10] sm:$0xff] }
  0x1a   :  { %v2126_v17 = vpack.c.bf16 %v470_v13, %v469_v12  ;;  %v906_v13 = vld [vmem:[%s3220_s5 + $0x8] sm:$0xff] }
  0x1b   :  { %1785 = vmatmul.mubr.msk.f32.vlgmr.msra.gmra.mrb[0].mxu0 %vm50_vm0, %v2535_v16  ;;  %v2022_v21 = vpack.c.bf16 %v2547_v20, %v2544_v19 }
  0x1c   :  { %1791 = vmatprep.mubr.msk.f32.mxu0 %vm50_vm0, %v2522_v2 }
  0x1d   :  { %2023 = vmatprep.subr.bf16.mxu0 %v2022_v21 }
  0x1e   :  { %2025 = vmatpush3.bf16.msra.mxu0 %v2022_v21  ;;  %v472_v21 = vld [vmem:[%s3218_s3 + $0x28] sm:$0xff] }
  0x1f   :  { %2027 = vmatprep.subr.bf16.mxu0 %v2026_v22 }
  0x21   :  { %1792 = vmatmul.mubr.msk.f32.vlgmr.msra.gmra.mrb[2].mxu0 %vm50_vm0, %v2535_v16 }
  0x22   :  { %2029 = vmatpush3.bf16.msra.mxu0 %v2026_v22 }
  0x23   :  { %2031 = vmatprep.subr.bf16.mxu0 %v2030_v25 }
  0x26   :  { %2033 = vmatpush3.bf16.msra.mxu0 %v2030_v25 }
  0x27   :  { %2035 = vmatprep.subr.bf16.mxu0 %v2034_v28 }
  0x2a   :  { %2037 = vmatpush3.bf16.msra.mxu0 %v2034_v28 }
  0x2b   :  { %2039 = vmatprep.subr.bf16.mxu0 %v2038_v31 }
  0x2e   :  { %2041 = vmatpush3.bf16.msra.mxu0 %v2038_v31 }
  0x2f   :  { %2043 = vmatprep.subr.bf16.mxu0 %v2042_v34 }
  0x32   :  { %2045 = vmatpush3.bf16.msra.mxu0 %v2042_v34 }
  0x33   :  { %2047 = vmatprep.subr.bf16.mxu0 %v2046_v37 }
  0x36   :  { %2049 = vmatpush3.bf16.msra.mxu0 %v2046_v37 }
  0x37   :  { %2051 = vmatprep.subr.bf16.mxu0 %v2050_v40 }
  0x3a   :  { %2053 = vmatpush3.bf16.msra.mxu0 %v2050_v40 }
  0x3b   :  { %2055 = vmatprep.subr.bf16.mxu0 %v2054_v43 }
  0x3e   :  { %2057 = vmatpush3.bf16.msra.mxu0 %v2054_v43 }
  0x3f   :  { %2059 = vmatprep.subr.bf16.mxu0 %v2026_v22 }
  0xee   :  { %v2599_v44 = vpop.f32.mrb[0].mxu0 }
  0xef   :  { %v123_v45 = vpop.f32.mrb[1].mxu0 }
  0xf4   :  { %v1793_v46 = vpop.f32.mrb[2].mxu0 }
  0xf5   :  { %v198_v47 = vpop.f32.mrb[3].mxu0 }
  0xf6   :  { %1826 = vmatprep.mubr.f32.mxu0 %v198_v47 }
  0xf7   :  { %1827 = vmatmul.mubr.f32.vlgmr.msra.gmra.mrb[4].mxu0 %v1793_v46  ;;  %v1576_v46 = vld [vmem:[%s3218_s3 + $0xb8] sm:$0xff] }
  0xf8   :  { %2061 = vmatpush3.bf16.msra.mxu0 %v2026_v22  ;;  %1861 = vmatprep.mubr.f32.mxu0 %v123_v45  ;;  %v2130_v22 = vpack.c.bf16 %v472_v21, %v471_v18 }
  0xf9   :  { %2063 = vmatprep.subr.bf16.mxu0 %v2030_v25 }
  0xfc   :  { %2065 = vmatpush3.bf16.msra.mxu0 %v2030_v25  ;;  %v2134_v25 = vpack.c.bf16 %v474_v24, %v473_v23  ;;  %v905_v24 = vld [vmem:[%s3220_s5] sm:$0xff] }
  0xfd   :  { %2067 = vmatprep.subr.bf16.mxu0 %v2034_v28 }
 0x100   :  { %2069 = vmatpush3.bf16.msra.mxu0 %v2034_v28  ;;  %v477_v28 = vld [vmem:[%s3218_s3 + $0x50] sm:$0xff] }
 0x101   :  { %2071 = vmatprep.subr.bf16.mxu0 %v2038_v31  ;;  %v2142_v30 = vpack.c.bf16 %v478_v29, %v477_v28  ;;  %v911_v29 = vld [vmem:[%s3220_s5 + $0x30] sm:$0xff] }
 0x104   :  { %2073 = vmatpush3.bf16.msra.mxu0 %v2038_v31  ;;  %v479_v31 = vld [vmem:[%s3218_s3 + $0x60] sm:$0xff] }
 0x105   :  { %2075 = vmatprep.subr.bf16.mxu0 %v2042_v34  ;;  %v2146_v33 = vpack.c.bf16 %v480_v32, %v479_v31  ;;  %v916_v31 = vld [vmem:[%s3220_s5 + $0x58] sm:$0xff] }
 0x108   :  { %2077 = vmatpush3.bf16.msra.mxu0 %v2042_v34  ;;  %v481_v34 = vld [vmem:[%s3218_s3 + $0x70] sm:$0xff] }
 0x109   :  { %2079 = vmatprep.subr.bf16.mxu0 %v2046_v37  ;;  %v2150_v36 = vpack.c.bf16 %v482_v35, %v481_v34  ;;  %v913_v34 = vld [vmem:[%s3220_s5 + $0x40] sm:$0xff]  ;;  %v915_v35 = vld [vmem:[%s3220_s5 + $0x50] sm:$0xff] }
 0x10c   :  { %2081 = vmatpush3.bf16.msra.mxu0 %v2046_v37  ;;  %v1569_v37 = vld [vmem:[%s3218_s3 + $0x80] sm:$0xff] }
 0x10d   :  { %2083 = vmatprep.subr.bf16.mxu0 %v2050_v40 }
 0x110   :  { %2085 = vmatpush3.bf16.msra.mxu0 %v2050_v40  ;;  %v1572_v40 = vld [vmem:[%s3218_s3 + $0x98] sm:$0xff] }
 0x111   :  { %2087 = vmatprep.subr.bf16.mxu0 %v2054_v43  ;;  %v2190_v41 = vpack.c.bf16 %v1572_v40, %v1571_v39  ;;  %v919_v39 = vld [vmem:[%s3220_s5 + $0x70] sm:$0xff]  ;;  %v922_v40 = vld [vmem:[%s3220_s5 + $0x88] sm:$0xff] }
 0x114   :  { %2089 = vmatpush3.bf16.msra.mxu0 %v2054_v43  ;;  %v1574_v43 = vld [vmem:[%s3218_s3 + $0xa8] sm:$0xff] }
 0x115   :  { %2091 = vmatprep.subr.bf16.mxu0 %v2090_v50 }
 0x117   :  { %1862 = vmatmul.mubr.f32.vlgmr.msra.gmra.mrb[4].mxu0 %v2599_v44 }
 0x118   :  { %2093 = vmatpush3.bf16.msra.mxu0 %v2090_v50  ;;  %1896 = vmatprep.mubr.f32.mxu0 %v123_v45  ;;  %v1575_v45 = vld [vmem:[%s3218_s3 + $0xb0] sm:$0xff] }
 0x119   :  { %2095 = vmatprep.subr.bf16.mxu0 %v2094_v53  ;;  %v2198_v47 = vpack.c.bf16 %v1576_v46, %v1575_v45  ;;  %v1579_v50 = vld [vmem:[%s3218_s3 + $0xd0] sm:$0xff]  ;;  %v926_v46 = vld [vmem:[%s3220_s5 + $0xa8] sm:$0xff] }
 0x11a   :  { %v2206_v52 = vpack.c.bf16 %v1580_v51, %v1579_v50  ;;  %v923_v45 = vld [vmem:[%s3220_s5 + $0x90] sm:$0xff]  ;;  %v930_v51 = vld [vmem:[%s3220_s5 + $0xc8] sm:$0xff] }
 0x11b   :  { %v927_v50 = vld [vmem:[%s3220_s5 + $0xb0] sm:$0xff] }
 0x11c   :  { %2097 = vmatpush3.bf16.msra.mxu0 %v2094_v53  ;;  %v1581_v53 = vld [vmem:[%s3218_s3 + $0xe0] sm:$0xff] }
 0x11d   :  { %2099 = vmatprep.subr.bf16.mxu0 %v2098_v56  ;;  %v2210_v55 = vpack.c.bf16 %v1582_v54, %v1581_v53 }
 0x120   :  { %2101 = vmatpush3.bf16.msra.mxu0 %v2098_v56  ;;  %v1583_v56 = vld [vmem:[%s3218_s3 + $0xf0] sm:$0xff] }
 0x121   :  { %2103 = vmatprep.subr.bf16.mxu0 %v2102_v59  ;;  %v2214_v58 = vpack.c.bf16 %v1584_v57, %v1583_v56  ;;  %v931_v56 = vld [vmem:[%s3220_s5 + $0xd0] sm:$0xff] }
 0x124   :  { %2105 = vmatpush3.bf16.msra.mxu0 %v2102_v59  ;;  %v1585_v59 = vld [vmem:[%s3219_s4] ss:$0 sm:$0xff] }
 0x125   :  { %2107 = vmatprep.subr.bf16.mxu0 %v2106_v62 }
 0x128   :  { %2109 = vmatpush3.bf16.msra.mxu0 %v2106_v62 }
 0x129   :  { %2111 = vmatprep.subr.bf16.mxu0 %v2110_v1 }
 0x12c   :  { %2113 = vmatpush3.bf16.msra.mxu0 %v2110_v1 }
 0x12d   :  { %2115 = vmatprep.subr.bf16.mxu0 %v2114_v5 }
 0x130   :  { %2117 = vmatpush3.bf16.msra.mxu0 %v2114_v5 }
 0x131   :  { %2119 = vmatprep.subr.bf16.mxu0 %v2118_v8 }
 0x134   :  { %2121 = vmatpush3.bf16.msra.mxu0 %v2118_v8 }
 0x135   :  { %2123 = vmatprep.subr.bf16.mxu0 %v2122_v11 }
 0x137   :  { %1897 = vmatmul.mubr.f32.vlgmr.msra.gmra.mrb[4].mxu0 %v2599_v44  ;;  %v2194_v44 = vpack.c.bf16 %v1574_v43, %v1573_v42 }
 0x138   :  { %2125 = vmatpush3.bf16.msra.mxu0 %v2122_v11  ;;  %1931 = vmatprep.mubr.f32.mxu0 %v2544_v19  ;;  %v476_v19 = vld [vmem:[%s3218_s3 + $0x48] sm:$0xff] }
 0x139   :  { %2127 = vmatprep.subr.bf16.mxu0 %v2126_v17  ;;  %v2138_v27 = vpack.c.bf16 %v476_v19, %v475_v26  ;;  %v910_v26 = vld [vmem:[%s3220_s5 + $0x28] sm:$0xff]  ;;  %v912_v19 = vld [vmem:[%s3220_s5 + $0x38] sm:$0xff] }
 0x13a   :  { %v2795_v28 = vpack.c.bf16 %v912_v19, %v910_v26  ;;  %v1603_v26 = vld [vmem:[%s3220_s5 + $0x158] sm:$0xff] }
 0x13c   :  { %2129 = vmatpush3.bf16.msra.mxu0 %v2126_v17 }
 0x13d   :  { %2131 = vmatprep.subr.bf16.mxu0 %v2130_v22 }
 0x140   :  { %2133 = vmatpush3.bf16.msra.mxu0 %v2130_v22 }
 0x141   :  { %2135 = vmatprep.subr.bf16.mxu0 %v2134_v25 }
 0x144   :  { %2137 = vmatpush3.bf16.msra.mxu0 %v2134_v25 }
 0x145   :  { %2139 = vmatprep.subr.bf16.mxu0 %v2138_v27 }
 0x148   :  { %2141 = vmatpush3.bf16.msra.mxu0 %v2138_v27 }
 0x149   :  { %2143 = vmatprep.subr.bf16.mxu0 %v2142_v30 }
 0x14c   :  { %2145 = vmatpush3.bf16.msra.mxu0 %v2142_v30 }
 0x14d   :  { %2147 = vmatprep.subr.bf16.mxu0 %v2146_v33 }
 0x150   :  { %2149 = vmatpush3.bf16.msra.mxu0 %v2146_v33 }
 0x151   :  { %2151 = vmatprep.subr.bf16.mxu0 %v2150_v36 }
 0x154   :  { %2153 = vmatpush3.bf16.msra.mxu0 %v2150_v36 }
 0x155   :  { %2155 = vmatprep.subr.bf16.mxu0 %v2122_v11 }
 0x157   :  { %1932 = vmatmul.mubr.f32.vlgmr.msra.gmra.mrb[4].mxu0 %v2547_v20  ;;  %v1570_v20 = vld [vmem:[%s3218_s3 + $0x88] sm:$0xff] }
 0x158   :  { %2157 = vmatpush3.bf16.msra.mxu0 %v2122_v11  ;;  %1966 = vmatprep.mubr.f32.mxu0 %v2528_v14  ;;  %v2186_v38 = vpack.c.bf16 %v1570_v20, %v1569_v37  ;;  %v2236_v37 = vpack.c.bf16 %v915_v35, %v913_v34  ;;  %v1606_v34 = vld [vmem:[%s3220_s5 + $0x170] sm:$0xff]  ;;  %v1609_v35 = vld [vmem:[%s3220_s5 + $0x188] sm:$0xff] }
 0x159   :  { %2159 = vmatprep.subr.bf16.mxu0 %v2126_v17 }
 0x15c   :  { %2161 = vmatpush3.bf16.msra.mxu0 %v2126_v17  ;;  %v908_v17 = vld [vmem:[%s3220_s5 + $0x18] sm:$0xff] }
 0x15d   :  { %2163 = vmatprep.subr.bf16.mxu0 %v2130_v22  ;;  %v2776_v23 = vpack.c.bf16 %v908_v17, %v906_v13  ;;  %v1599_v13 = vld [vmem:[%s3220_s5 + $0x138] sm:$0xff] }
 0x160   :  { %2165 = vmatpush3.bf16.msra.mxu0 %v2130_v22 }
 0x161   :  { %2167 = vmatprep.subr.bf16.mxu0 %v2134_v25 }
 0x164   :  { %2169 = vmatpush3.bf16.msra.mxu0 %v2134_v25  ;;  %v907_v25 = vld [vmem:[%s3220_s5 + $0x10] sm:$0xff] }
 0x165   :  { %2171 = vmatprep.subr.bf16.mxu0 %v2138_v27 }
 0x168   :  { %2173 = vmatpush3.bf16.msra.mxu0 %v2138_v27  ;;  %v2792_v27 = vpack.c.bf16 %v907_v25, %v905_v24  ;;  %v1598_v24 = vld [vmem:[%s3220_s5 + $0x130] sm:$0xff]  ;;  %v1601_v25 = vld [vmem:[%s3220_s5 + $0x148] sm:$0xff] }
 0x169   :  { %2175 = vmatprep.subr.bf16.mxu0 %v2142_v30 }
 0x16c   :  { %2177 = vmatpush3.bf16.msra.mxu0 %v2142_v30  ;;  %v914_v30 = vld [vmem:[%s3220_s5 + $0x48] sm:$0xff] }
 0x16d   :  { %2179 = vmatprep.subr.bf16.mxu0 %v2146_v33 }
 0x170   :  { %2181 = vmatpush3.bf16.msra.mxu0 %v2146_v33  ;;  %v2234_v33 = vpack.c.bf16 %v916_v31, %v914_v30  ;;  %v1607_v30 = vld [vmem:[%s3220_s5 + $0x178] sm:$0xff] }
 0x171   :  { %2183 = vmatprep.subr.bf16.mxu0 %v2150_v36 }
 0x174   :  { %2185 = vmatpush3.bf16.msra.mxu0 %v2150_v36  ;;  %v918_v36 = vld [vmem:[%s3220_s5 + $0x68] sm:$0xff] }
 0x175   :  { %2187 = vmatprep.subr.bf16.mxu0 %v2186_v38 }
 0x177   :  { %1967 = vmatmul.mubr.f32.vlgmr.msra.gmra.mrb[4].mxu0 %v2530_v15 }
 0x178   :  { %2189 = vmatpush3.bf16.msra.mxu0 %v2186_v38  ;;  %2001 = vmatprep.mubr.f32.mxu0 %v2528_v14  ;;  %v1578_v14 = vld [vmem:[%s3218_s3 + $0xc8] sm:$0xff]  ;;  %v917_v38 = vld [vmem:[%s3220_s5 + $0x60] sm:$0xff] }
 0x179   :  { %2191 = vmatprep.subr.bf16.mxu0 %v2190_v41  ;;  %v2202_v49 = vpack.c.bf16 %v1578_v14, %v1577_v48  ;;  %v2240_v42 = vpack.c.bf16 %v919_v39, %v917_v38  ;;  %v1610_v38 = vld [vmem:[%s3220_s5 + $0x190] sm:$0xff]  ;;  %v1613_v39 = vld [vmem:[%s3220_s5 + $0x1a8] sm:$0xff] }
 0x17c   :  { %2193 = vmatpush3.bf16.msra.mxu0 %v2190_v41  ;;  %v924_v41 = vld [vmem:[%s3220_s5 + $0x98] sm:$0xff] }
 0x17d   :  { %2195 = vmatprep.subr.bf16.mxu0 %v2194_v44  ;;  %v2242_v43 = vpack.c.bf16 %v924_v41, %v922_v40  ;;  %v1615_v40 = vld [vmem:[%s3220_s5 + $0x1b8] sm:$0xff] }
 0x180   :  { %2197 = vmatpush3.bf16.msra.mxu0 %v2194_v44  ;;  %v921_v44 = vld [vmem:[%s3220_s5 + $0x80] sm:$0xff] }
 0x181   :  { %2199 = vmatprep.subr.bf16.mxu0 %v2198_v47  ;;  %v2244_v48 = vpack.c.bf16 %v923_v45, %v921_v44  ;;  %v1614_v44 = vld [vmem:[%s3220_s5 + $0x1b0] sm:$0xff]  ;;  %v1617_v45 = vld [vmem:[%s3220_s5 + $0x1c8] sm:$0xff] }
 0x184   :  { %2201 = vmatpush3.bf16.msra.mxu0 %v2198_v47  ;;  %v928_v47 = vld [vmem:[%s3220_s5 + $0xb8] sm:$0xff] }
 0x185   :  { %2203 = vmatprep.subr.bf16.mxu0 %v2202_v49  ;;  %v2246_v14 = vpack.c.bf16 %v928_v47, %v926_v46  ;;  %v1619_v46 = vld [vmem:[%s3220_s5 + $0x1d8] sm:$0xff] }
 0x188   :  { %2205 = vmatpush3.bf16.msra.mxu0 %v2202_v49  ;;  %v925_v49 = vld [vmem:[%s3220_s5 + $0xa0] sm:$0xff] }
 0x189   :  { %2207 = vmatprep.subr.bf16.mxu0 %v2206_v52  ;;  %v2248_v53 = vpack.c.bf16 %v927_v50, %v925_v49  ;;  %v1618_v49 = vld [vmem:[%s3220_s5 + $0x1d0] sm:$0xff]  ;;  %v1621_v50 = vld [vmem:[%s3220_s5 + $0x1e8] sm:$0xff] }
 0x18c   :  { %2209 = vmatpush3.bf16.msra.mxu0 %v2206_v52  ;;  %v932_v52 = vld [vmem:[%s3220_s5 + $0xd8] sm:$0xff] }
 0x18d   :  { %2211 = vmatprep.subr.bf16.mxu0 %v2210_v55  ;;  %v2250_v54 = vpack.c.bf16 %v932_v52, %v930_v51  ;;  %v1623_v51 = vld [vmem:[%s3220_s5 + $0x1f8] sm:$0xff] }
 0x190   :  { %2213 = vmatpush3.bf16.msra.mxu0 %v2210_v55  ;;  %v929_v55 = vld [vmem:[%s3220_s5 + $0xc0] sm:$0xff] }
 0x191   :  { %2215 = vmatprep.subr.bf16.mxu0 %v2214_v58  ;;  %v2252_v57 = vpack.c.bf16 %v931_v56, %v929_v55  ;;  %v1622_v55 = vld [vmem:[%s3220_s5 + $0x1f0] sm:$0xff]  ;;  %v1206_v56 = vld [vmem:[%s3221_s6 + $0x8] sm:$0xff] }
 0x194   :  { %2217 = vmatpush3.bf16.msra.mxu0 %v2214_v58  ;;  %v934_v58 = vld [vmem:[%s3220_s5 + $0xe8] sm:$0xff] }
 0x197   :  { %2002 = vmatmul.mubr.f32.vlgmr.msra.gmra.mrb[4].mxu0 %v2530_v15 }
 0x26a   :  { %v2003_v60 = vpop.f32.mrb[4].mxu0 }
 0x26b   :  { %v737_v61 = vadd.f32 %v2003_v60, %v1585_v59  ;;  %v716_v62 = vpop.f32.mrb[5].mxu0 }
 0x26c   :  { %v736_v63 = vadd.f32 %v1585_v59, %v716_v62  ;;  %v936_v59 = vld [vmem:[%s3220_s5 + $0xf8] sm:$0xff]  ;;  %v935_v62 = vld [vmem:[%s3220_s5 + $0xf0] sm:$0xff] }
 0x26d   :  { %v741_v0 = vmin.f32 %v737_v61, 0.0  ;;  %vm739_vm3 = vcmp.gt.f32.partialorder %v737_v61, 0.0  ;;  %v2254_v60 = vpack.c.bf16 %v936_v59, %v934_v58 }
 0x26e   :  { %v740_v1 = vmin.f32 %v736_v63, 0.0  ;;  %vm738_vm4 = vcmp.gt.f32.partialorder %v736_v63, 0.0 }
 0x26f   :  { %v744_v3 = vmul.f32 1.442695, %v741_v0  ;;  %v2467_v0 = vmov 0.0  }
 0x270   :  { %v742_v4 = vmul.f32 1.442695, %v740_v1 }
 0x271   :  { %2453 = vpow2.f32 %v744_v3 }
 0x272   :  { %2455 = vpow2.f32 %v742_v4 }
 0x27b   :  { %v2454_v5 = vpop.eup %2453 }
 0x27c   :  { %v2456_v6 = vpop.eup %2455  ;;  %v1587_v7 = vadd.f32 -1.0, %v2454_v5 }
 0x27d   :  { %v1586_v8 = vadd.f32 -1.0, %v2456_v6  ;;  %v1593_v6 = vld [vmem:[%s3220_s5 + $0x108] sm:$0xff] }
 0x27e   :  { %v749_v15 = vsel %vm739_vm3, %v737_v61, %v1587_v7  ;;  %v933_v61 = vld [vmem:[%s3220_s5 + $0xe0] sm:$0xff]  ;;  %v1595_v7 = vld [vmem:[%s3220_s5 + $0x118] sm:$0xff] }
 0x27f   :  { %v748_v9 = vsel %vm738_vm4, %v736_v63, %v1586_v8  ;;  %v2256_v63 = vpack.c.bf16 %v935_v62, %v933_v61  ;;  %v2290_v8 = vpack.c.bf16 %v1595_v7, %v1593_v6  ;;  %v1207_v61 = vld [vmem:[%s3221_s6 + $0x10] sm:$0xff]  ;;  %v1210_v62 = vld [vmem:[%s3221_s6 + $0x28] sm:$0xff]  ;;  %v1209_v6 = vld [vmem:[%s3221_s6 + $0x20] sm:$0xff] }
 0x280   :  { %v750_v10 = vpack.c.bf16 %v749_v15, %v748_v9  ;;  %v1211_v7 = vld [vmem:[%s3221_s6 + $0x30] sm:$0xff] }
 0x282   :  { %2219 = vmatprep.subr.bf16.mxu1 %v750_v10  ;;  %v2756_v11 = vunpack.c.l.bf16 %v750_v10  ;;  %v2758_v12 = vunpack.c.h.bf16 %v750_v10 }
 0x283   :  { %2221 = vmatpush3.bf16.msra.mxu1 %v750_v10  ;;  %v1597_v10 = vld [vmem:[%s3220_s5 + $0x128] sm:$0xff] }
 0x284   :  { %v2767_v18 = vsub.f32 %v748_v9, %v2756_v11  ;;  %v2770_v21 = vsub.f32 %v749_v15, %v2758_v12  ;;  %v1592_v15 = vld [vmem:[%s3220_s5 + $0x100] sm:$0xff]  ;;  %v1594_v9 = vld [vmem:[%s3220_s5 + $0x110] sm:$0xff] }
 0x285   :  { %v2292_v17 = vpack.c.bf16 %v1594_v9, %v1592_v15  ;;  %v1216_v15 = vld [vmem:[%s3221_s6 + $0x58] sm:$0xff]  ;;  %v2328_v9 = vpack.c.bf16 %v1211_v7, %v1209_v6  ;;  %v1638_v6 = vld [vmem:[%s3221_s6 + $0x170] sm:$0xff]  ;;  %v1641_v7 = vld [vmem:[%s3221_s6 + $0x188] sm:$0xff] }
 0x286   :  { %2009 = vmatmul.mubr.msk.f32.vlgmr.msra.gmra.mrb[0].mxu1 %vm50_vm0, %v2535_v16  ;;  %v2222_v22 = vpack.c.bf16 %v2770_v21, %v2767_v18 }
 0x287   :  { %2015 = vmatprep.mubr.msk.f32.mxu1 %vm50_vm0, %v2522_v2  ;;  %v909_v2 = vld [vmem:[%s3220_s5 + $0x20] sm:$0xff] }
 0x288   :  { %2223 = vmatprep.subr.bf16.mxu1 %v2222_v22  ;;  %v2232_v32 = vpack.c.bf16 %v911_v29, %v909_v2  ;;  %v1602_v2 = vld [vmem:[%s3220_s5 + $0x150] sm:$0xff]  ;;  %v1605_v29 = vld [vmem:[%s3220_s5 + $0x168] sm:$0xff] }
 0x289   :  { %2225 = vmatpush3.bf16.msra.mxu1 %v2222_v22  ;;  %v2294_v22 = vpack.c.bf16 %v1599_v13, %v1597_v10  ;;  %v1213_v13 = vld [vmem:[%s3221_s6 + $0x40] sm:$0xff] }
 0x28a   :  { %2227 = vmatprep.subr.bf16.mxu1 %v2776_v23 }
 0x28c   :  { %2016 = vmatmul.mubr.msk.f32.vlgmr.msra.gmra.mrb[2].mxu1 %vm50_vm0, %v2535_v16  ;;  %v920_v16 = vld [vmem:[%s3220_s5 + $0x78] sm:$0xff] }
 0x28d   :  { %2229 = vmatpush1.bf16.msra.mxu1 %v2792_v27  ;;  %v2238_v20 = vpack.c.bf16 %v920_v16, %v918_v36  ;;  %1034 = vmatprep.mubr.f32.mxu1 %v2467_v0  ;;  %v1611_v36 = vld [vmem:[%s3220_s5 + $0x198] sm:$0xff] }
 0x28e   :  { %2231 = vmatprep.subr.bf16.mxu1 %v2795_v28 }
 0x291   :  { %2233 = vmatpush1.bf16.msra.mxu1 %v2232_v32 }
 0x292   :  { %2235 = vmatprep.subr.bf16.mxu1 %v2234_v33 }
 0x295   :  { %2237 = vmatpush1.bf16.msra.mxu1 %v2236_v37 }
 0x296   :  { %2239 = vmatprep.subr.bf16.mxu1 %v2238_v20 }
 0x299   :  { %2241 = vmatpush1.bf16.msra.mxu1 %v2240_v42 }
 0x29a   :  { %2243 = vmatprep.subr.bf16.mxu1 %v2242_v43 }
 0x29d   :  { %2245 = vmatpush1.bf16.msra.mxu1 %v2244_v48 }
 0x29e   :  { %2247 = vmatprep.subr.bf16.mxu1 %v2246_v14 }
 0x2a1   :  { %2249 = vmatpush1.bf16.msra.mxu1 %v2248_v53 }
 0x2a2   :  { %2251 = vmatprep.subr.bf16.mxu1 %v2250_v54 }
 0x2a5   :  { %2253 = vmatpush1.bf16.msra.mxu1 %v2252_v57 }
 0x2a6   :  { %2255 = vmatprep.subr.bf16.mxu1 %v2254_v60 }
 0x2a9   :  { %2257 = vmatpush1.bf16.msra.mxu1 %v2256_v63 }
 0x2aa   :  { %2259 = vmatprep.subr.bf16.mxu1 %v2776_v23  ;;  %v1596_v23 = vld [vmem:[%s3220_s5 + $0x120] sm:$0xff] }
 0x2ab   :  { %v2296_v19 = vpack.c.bf16 %v1598_v24, %v1596_v23 }
 0x359   :  { %v2881_v1 = vpop.f32.mrb[0].mxu1 }
 0x35a   :  { %v2883_v3 = vpop.f32.mrb[1].mxu1 }
 0x35f   :  { %v2017_v4 = vpop.f32.mrb[2].mxu1 }
 0x360   :  { %v896_v5 = vpop.f32.mrb[3].mxu1 }
 0x361   :  { %1035 = vmatmul.mubr.f32.vlgmr.msra.gmra.mrb[4].mxu1 %v896_v5 }
 0x362   :  { %2261 = vmatpush1.bf16.msra.mxu1 %v2792_v27  ;;  %1040 = vmatprep.mubr.f32.mxu1 %v2467_v0  ;;  %v2298_v27 = vpack.c.bf16 %v1603_v26, %v1601_v25  ;;  %v1217_v25 = vld [vmem:[%s3221_s6 + $0x60] sm:$0xff]  ;;  %v1219_v26 = vld [vmem:[%s3221_s6 + $0x70] sm:$0xff] }
 0x363   :  { %2263 = vmatprep.subr.bf16.mxu1 %v2795_v28  ;;  %v1600_v28 = vld [vmem:[%s3220_s5 + $0x140] sm:$0xff] }
 0x364   :  { %v2300_v31 = vpack.c.bf16 %v1602_v2, %v1600_v28  ;;  %v1221_v2 = vld [vmem:[%s3221_s6 + $0x80] sm:$0xff] }
 0x365   :  { %1041 = vmatmul.mubr.f32.gmra.mrb[6].mxu1 %v2017_v4 }
 0x366   :  { %2265 = vmatpush1.bf16.msra.mxu1 %v2232_v32  ;;  %1111 = vmatprep.mubr.f32.mxu1 %v2467_v0  ;;  %v2302_v32 = vpack.c.bf16 %v1607_v30, %v1605_v29  ;;  %v1223_v29 = vld [vmem:[%s3221_s6 + $0x90] sm:$0xff]  ;;  %v1226_v30 = vld [vmem:[%s3221_s6 + $0xa8] sm:$0xff] }
 0x367   :  { %2267 = vmatprep.subr.bf16.mxu1 %v2234_v33  ;;  %v1604_v33 = vld [vmem:[%s3220_s5 + $0x160] sm:$0xff] }
 0x368   :  { %v2304_v16 = vpack.c.bf16 %v1606_v34, %v1604_v33  ;;  %v1225_v34 = vld [vmem:[%s3221_s6 + $0xa0] sm:$0xff] }
 0x36a   :  { %2269 = vmatpush1.bf16.msra.mxu1 %v2236_v37  ;;  %v2306_v37 = vpack.c.bf16 %v1611_v36, %v1609_v35  ;;  %v1227_v35 = vld [vmem:[%s3221_s6 + $0xb0] sm:$0xff]  ;;  %v1230_v36 = vld [vmem:[%s3221_s6 + $0xc8] sm:$0xff] }
 0x36b   :  { %2271 = vmatprep.subr.bf16.mxu1 %v2238_v20  ;;  %v1608_v20 = vld [vmem:[%s3220_s5 + $0x180] sm:$0xff] }
 0x36c   :  { %v2308_v41 = vpack.c.bf16 %v1610_v38, %v1608_v20  ;;  %v1229_v38 = vld [vmem:[%s3221_s6 + $0xc0] sm:$0xff] }
 0x36e   :  { %2273 = vmatpush1.bf16.msra.mxu1 %v2240_v42  ;;  %v2310_v42 = vpack.c.bf16 %v1615_v40, %v1613_v39  ;;  %v1231_v39 = vld [vmem:[%s3221_s6 + $0xd0] sm:$0xff]  ;;  %v1234_v40 = vld [vmem:[%s3221_s6 + $0xe8] sm:$0xff] }
 0x36f   :  { %2275 = vmatprep.subr.bf16.mxu1 %v2242_v43  ;;  %v1612_v43 = vld [vmem:[%s3220_s5 + $0x1a0] sm:$0xff] }
 0x370   :  { %v2312_v47 = vpack.c.bf16 %v1614_v44, %v1612_v43  ;;  %v1233_v44 = vld [vmem:[%s3221_s6 + $0xe0] sm:$0xff] }
 0x372   :  { %2277 = vmatpush1.bf16.msra.mxu1 %v2244_v48  ;;  %v2314_v48 = vpack.c.bf16 %v1619_v46, %v1617_v45  ;;  %v1235_v45 = vld [vmem:[%s3221_s6 + $0xf0] sm:$0xff] }
 0x373   :  { %2279 = vmatprep.subr.bf16.mxu1 %v2246_v14  ;;  %v1616_v14 = vld [vmem:[%s3220_s5 + $0x1c0] sm:$0xff]  ;;  %v2352_v46 = vpack.c.bf16 %v1235_v45, %v1233_v44 }
 0x374   :  { %v2316_v52 = vpack.c.bf16 %v1618_v49, %v1616_v14  ;;  %v1626_v14 = vld [vmem:[%s3221_s6 + $0x110] sm:$0xff]  ;;  %v1629_v49 = vld [vmem:[%s3221_s6 + $0x128] sm:$0xff] }
 0x376   :  { %2281 = vmatpush1.bf16.msra.mxu1 %v2248_v53  ;;  %v2318_v53 = vpack.c.bf16 %v1623_v51, %v1621_v50  ;;  %v1631_v50 = vld [vmem:[%s3221_s6 + $0x138] sm:$0xff] }
 0x377   :  { %2283 = vmatprep.subr.bf16.mxu1 %v2250_v54  ;;  %v1620_v54 = vld [vmem:[%s3220_s5 + $0x1e0] sm:$0xff] }
 0x378   :  { %v2320_v58 = vpack.c.bf16 %v1622_v55, %v1620_v54  ;;  %v1630_v54 = vld [vmem:[%s3221_s6 + $0x130] sm:$0xff]  ;;  %v1633_v55 = vld [vmem:[%s3221_s6 + $0x148] sm:$0xff] }
 0x37a   :  { %2285 = vmatpush1.bf16.msra.mxu1 %v2252_v57  ;;  %v1208_v57 = vld [vmem:[%s3221_s6 + $0x18] sm:$0xff] }
 0x37b   :  { %2287 = vmatprep.subr.bf16.mxu1 %v2254_v60  ;;  %v2995_v59 = vpack.c.bf16 %v1208_v57, %v1206_v56  ;;  %v1205_v60 = vld [vmem:[%s3221_s6] sm:$0xff]  ;;  %v1635_v56 = vld [vmem:[%s3221_s6 + $0x158] sm:$0xff] }
 0x37c   :  { %v2324_v4 = vpack.c.bf16 %v1207_v61, %v1205_v60  ;;  %v1634_v60 = vld [vmem:[%s3221_s6 + $0x150] sm:$0xff]  ;;  %v1637_v61 = vld [vmem:[%s3221_s6 + $0x168] sm:$0xff] }
 0x37e   :  { %2289 = vmatpush1.bf16.msra.mxu1 %v2256_v63  ;;  %v1212_v63 = vld [vmem:[%s3221_s6 + $0x38] sm:$0xff] }
 0x37f   :  { %2291 = vmatprep.subr.bf16.mxu1 %v2290_v8  ;;  %v2326_v5 = vpack.c.bf16 %v1212_v63, %v1210_v62  ;;  %v1214_v8 = vld [vmem:[%s3221_s6 + $0x48] sm:$0xff]  ;;  %v1639_v62 = vld [vmem:[%s3221_s6 + $0x178] sm:$0xff] }
 0x380   :  { %v2330_v10 = vpack.c.bf16 %v1216_v15, %v1214_v8  ;;  %v1643_v8 = vld [vmem:[%s3221_s6 + $0x198] sm:$0xff] }
 0x381   :  { %1112 = vmatmul.mubr.f32.vlgmr.msra.gmra.mrb[4].mxu1 %v2883_v3 }
 0x382   :  { %2293 = vmatpush1.bf16.msra.mxu1 %v2292_v17  ;;  %1117 = vmatprep.mubr.f32.mxu1 %v2467_v0  ;;  %v1215_v17 = vld [vmem:[%s3221_s6 + $0x50] sm:$0xff] }
 0x383   :  { %2295 = vmatprep.subr.bf16.mxu1 %v2294_v22  ;;  %v1218_v22 = vld [vmem:[%s3221_s6 + $0x68] sm:$0xff]  ;;  %v2332_v23 = vpack.c.bf16 %v1215_v17, %v1213_v13  ;;  %v1642_v13 = vld [vmem:[%s3221_s6 + $0x190] sm:$0xff] }
 0x384   :  { %v1645_v17 = vld [vmem:[%s3221_s6 + $0x1a8] sm:$0xff] }
 0x385   :  { %1118 = vmatmul.mubr.f32.gmra.mrb[6].mxu1 %v2881_v1 }
 0x386   :  { %2297 = vmatpush1.bf16.msra.mxu1 %v2296_v19  ;;  %1188 = vmatprep.mubr.f32.mxu1 %v2467_v0  ;;  %v1222_v19 = vld [vmem:[%s3221_s6 + $0x88] sm:$0xff] }
 0x387   :  { %2299 = vmatprep.subr.bf16.mxu1 %v2298_v27  ;;  %v2336_v27 = vpack.c.bf16 %v1219_v26, %v1217_v25  ;;  %v1646_v25 = vld [vmem:[%s3221_s6 + $0x1b0] sm:$0xff]  ;;  %v1649_v26 = vld [vmem:[%s3221_s6 + $0x1c8] sm:$0xff] }
 0x38a   :  { %2301 = vmatpush1.bf16.msra.mxu1 %v2300_v31  ;;  %v1228_v31 = vld [vmem:[%s3221_s6 + $0xb8] sm:$0xff] }
 0x38b   :  { %2303 = vmatprep.subr.bf16.mxu1 %v2302_v32  ;;  %v2340_v32 = vpack.c.bf16 %v1223_v29, %v1221_v2  ;;  %v2342_v33 = vpack.c.bf16 %v1228_v31, %v1226_v30  ;;  %v1650_v2 = vld [vmem:[%s3221_s6 + $0x1d0] sm:$0xff]  ;;  %v1653_v29 = vld [vmem:[%s3221_s6 + $0x1e8] sm:$0xff]  ;;  %v1655_v30 = vld [vmem:[%s3221_s6 + $0x1f8] sm:$0xff] }
 0x38e   :  { %2305 = vmatpush1.bf16.msra.mxu1 %v2304_v16  ;;  %v1232_v16 = vld [vmem:[%s3221_s6 + $0xd8] sm:$0xff] }
 0x38f   :  { %2307 = vmatprep.subr.bf16.mxu1 %v2306_v37  ;;  %v2344_v37 = vpack.c.bf16 %v1227_v35, %v1225_v34  ;;  %v2346_v20 = vpack.c.bf16 %v1232_v16, %v1230_v36  ;;  %v1654_v34 = vld [vmem:[%s3221_s6 + $0x1f0] sm:$0xff]  ;;  %v1511_v36 = vlaneseq }
 0x391   :  { %v1512_v16 = vshrl.u32 %v1511_v36, 7 }
 0x392   :  { %2309 = vmatpush1.bf16.msra.mxu1 %v2308_v41  ;;  %v1236_v41 = vld [vmem:[%s3221_s6 + $0xf8] sm:$0xff] }
 0x393   :  { %2311 = vmatprep.subr.bf16.mxu1 %v2310_v42  ;;  %v2348_v42 = vpack.c.bf16 %v1231_v39, %v1229_v38  ;;  %v2350_v43 = vpack.c.bf16 %v1236_v41, %v1234_v40 }
 0x396   :  { %2313 = vmatpush1.bf16.msra.mxu1 %v2312_v47 }
 0x397   :  { %2315 = vmatprep.subr.bf16.mxu1 %v2314_v48  ;;  %v1624_v48 = vld [vmem:[%s3221_s6 + $0x100] sm:$0xff] }
 0x398   :  { %v2388_v51 = vpack.c.bf16 %v1626_v14, %v1624_v48 }
 0x39a   :  { %2317 = vmatpush1.bf16.msra.mxu1 %v2316_v52  ;;  %v2390_v52 = vpack.c.bf16 %v1631_v50, %v1629_v49 }
 0x39b   :  { %2319 = vmatprep.subr.bf16.mxu1 %v2318_v53  ;;  %v1628_v53 = vld [vmem:[%s3221_s6 + $0x120] sm:$0xff] }
 0x39c   :  { %v2392_v57 = vpack.c.bf16 %v1630_v54, %v1628_v53 }
 0x39e   :  { %2321 = vmatpush1.bf16.msra.mxu1 %v2320_v58  ;;  %v2394_v58 = vpack.c.bf16 %v1635_v56, %v1633_v55 }
 0x39f   :  { %2323 = vmatprep.subr.bf16.mxu1 %v2995_v59 }
 0x3a1   :  { %1189 = vmatmul.mubr.f32.vlgmr.msra.gmra.mrb[4].mxu1 %v2883_v3  ;;  %v1220_v3 = vld [vmem:[%s3221_s6 + $0x78] sm:$0xff] }
 0x3a2   :  { %2325 = vmatpush1.bf16.msra.mxu1 %v2324_v4  ;;  %1194 = vmatprep.mubr.f32.mxu1 %v2467_v0  ;;  %v2334_v24 = vpack.c.bf16 %v1220_v3, %v1218_v22  ;;  %v1647_v22 = vld [vmem:[%s3221_s6 + $0x1b8] sm:$0xff] }
 0x3a3   :  { %2327 = vmatprep.subr.bf16.mxu1 %v2326_v5 }
 0x3a5   :  { %1195 = vmatmul.mubr.f32.gmra.mrb[6].mxu1 %v2881_v1  ;;  %v1224_v1 = vld [vmem:[%s3221_s6 + $0x98] sm:$0xff] }
 0x3a6   :  { %2329 = vmatpush1.bf16.msra.mxu1 %v2328_v9  ;;  %1334 = vmatprep.mubr.f32.mxu1 %v2467_v0  ;;  %v2338_v28 = vpack.c.bf16 %v1224_v1, %v1222_v19  ;;  %v1651_v19 = vld [vmem:[%s3221_s6 + $0x1d8] sm:$0xff] }
 0x3a7   :  { %2331 = vmatprep.subr.bf16.mxu1 %v2330_v10 }
 0x3aa   :  { %2333 = vmatpush1.bf16.msra.mxu1 %v2332_v23 }
 0x3ab   :  { %2335 = vmatprep.subr.bf16.mxu1 %v2334_v24 }
 0x3ae   :  { %2337 = vmatpush1.bf16.msra.mxu1 %v2336_v27 }
 0x3af   :  { %2339 = vmatprep.subr.bf16.mxu1 %v2338_v28 }
 0x3b2   :  { %2341 = vmatpush1.bf16.msra.mxu1 %v2340_v32 }
 0x3b3   :  { %2343 = vmatprep.subr.bf16.mxu1 %v2342_v33 }
 0x3b6   :  { %2345 = vmatpush1.bf16.msra.mxu1 %v2344_v37 }
 0x3b7   :  { %2347 = vmatprep.subr.bf16.mxu1 %v2346_v20 }
 0x3ba   :  { %2349 = vmatpush1.bf16.msra.mxu1 %v2348_v42 }
 0x3bb   :  { %2351 = vmatprep.subr.bf16.mxu1 %v2350_v43 }
 0x3be   :  { %2353 = vmatpush1.bf16.msra.mxu1 %v2352_v46 }
 0x3bf   :  { %2355 = vmatprep.subr.bf16.mxu1 %v2995_v59  ;;  %v1632_v59 = vld [vmem:[%s3221_s6 + $0x140] sm:$0xff] }
 0x3c0   :  { %v2396_v63 = vpack.c.bf16 %v1634_v60, %v1632_v59 }
 0x3c1   :  { %1335 = vmatmul.mubr.f32.vlgmr.msra.gmra.mrb[4].mxu1 %v2767_v18  ;;  %v1625_v18 = vld [vmem:[%s3221_s6 + $0x108] sm:$0xff] }
 0x3c2   :  { %2357 = vmatpush1.bf16.msra.mxu1 %v2324_v4  ;;  %1340 = vmatprep.mubr.f32.mxu1 %v2467_v0  ;;  %v2398_v4 = vpack.c.bf16 %v1639_v62, %v1637_v61 }
 0x3c3   :  { %2359 = vmatprep.subr.bf16.mxu1 %v2326_v5  ;;  %v1636_v5 = vld [vmem:[%s3221_s6 + $0x160] sm:$0xff] }
 0x3c4   :  { %v2400_v15 = vpack.c.bf16 %v1638_v6, %v1636_v5 }
 0x3c5   :  { %1341 = vmatmul.mubr.f32.gmra.mrb[6].mxu1 %v2770_v21  ;;  %v1627_v21 = vld [vmem:[%s3221_s6 + $0x118] sm:$0xff] }
 0x3c6   :  { %2361 = vmatpush1.bf16.msra.mxu1 %v2328_v9  ;;  %1411 = vmatprep.mubr.f32.mxu1 %v2467_v0  ;;  %v2386_v47 = vpack.c.bf16 %v1627_v21, %v1625_v18  ;;  %v2402_v9 = vpack.c.bf16 %v1643_v8, %v1641_v7 }
 0x3c7   :  { %2363 = vmatprep.subr.bf16.mxu1 %v2330_v10  ;;  %v1640_v10 = vld [vmem:[%s3221_s6 + $0x180] sm:$0xff] }
 0x3c8   :  { %v2404_v3 = vpack.c.bf16 %v1642_v13, %v1640_v10 }
 0x3ca   :  { %2365 = vmatpush1.bf16.msra.mxu1 %v2332_v23  ;;  %v2406_v23 = vpack.c.bf16 %v1647_v22, %v1645_v17 }
 0x3cb   :  { %2367 = vmatprep.subr.bf16.mxu1 %v2334_v24  ;;  %v1644_v24 = vld [vmem:[%s3221_s6 + $0x1a0] sm:$0xff] }
 0x3cc   :  { %v2408_v1 = vpack.c.bf16 %v1646_v25, %v1644_v24 }
 0x3ce   :  { %2369 = vmatpush1.bf16.msra.mxu1 %v2336_v27  ;;  %v2410_v27 = vpack.c.bf16 %v1651_v19, %v1649_v26 }
 0x3cf   :  { %2371 = vmatprep.subr.bf16.mxu1 %v2338_v28  ;;  %v1648_v28 = vld [vmem:[%s3221_s6 + $0x1c0] sm:$0xff] }
 0x3d0   :  { %v2412_v31 = vpack.c.bf16 %v1650_v2, %v1648_v28 }
 0x3d2   :  { %2373 = vmatpush1.bf16.msra.mxu1 %v2340_v32  ;;  %v2414_v32 = vpack.c.bf16 %v1655_v30, %v1653_v29 }
 0x3d3   :  { %2375 = vmatprep.subr.bf16.mxu1 %v2342_v33  ;;  %v1652_v33 = vld [vmem:[%s3221_s6 + $0x1e0] sm:$0xff] }
 0x3d4   :  { %v2416_v35 = vpack.c.bf16 %v1654_v34, %v1652_v33 }
 0x3d6   :  { %2377 = vmatpush1.bf16.msra.mxu1 %v2344_v37  ;;  %v1517_v37 = vsub.s32 1, %v1512_v16 }
 0x3d7   :  { %2379 = vmatprep.subr.bf16.mxu1 %v2346_v20  ;;  %v1509_v20 = vld [vmem:[%s3222_s7] sm:$0x3] }
 0x3d8   :  { %v1518_v38 = vrot.slane %v1509_v20, %v1517_v37 }
 0x3da   :  { %2381 = vmatpush1.bf16.msra.mxu1 %v2348_v42 }
 0x3db   :  { %2383 = vmatprep.subr.bf16.mxu1 %v2350_v43 }
 0x3de   :  { %2385 = vmatpush1.bf16.msra.mxu1 %v2352_v46 }
 0x3df   :  { %2387 = vmatprep.subr.bf16.mxu1 %v2386_v47  ;;  %v1513_v47 = vsub.s32 0, %v1512_v16 }
 0x3e1   :  { %1412 = vmatmul.mubr.f32.vlgmr.msra.gmra.mrb[4].mxu1 %v2756_v11  ;;  %v1514_v14 = vrot.slane %v1509_v20, %v1513_v47 }
 0x3e2   :  { %2389 = vmatpush1.bf16.msra.mxu1 %v2388_v51  ;;  %1417 = vmatprep.mubr.f32.mxu1 %v2467_v0 }
 0x3e3   :  { %2391 = vmatprep.subr.bf16.mxu1 %v2390_v52  ;;  %v2465_v52 = vld [vmem:[%s3215_s0] sm:$0xff] }
 0x3e5   :  { %1418 = vmatmul.mubr.f32.gmra.mrb[6].mxu1 %v2758_v12 }
 0x3e6   :  { %2393 = vmatpush1.bf16.msra.mxu1 %v2392_v57  ;;  %1488 = vmatprep.mubr.f32.mxu1 %v2467_v0  ;;  %v2466_v57 = vld [vmem:[%s3215_s0 + $0x8] sm:$0xff] }
 0x3e7   :  { %2395 = vmatprep.subr.bf16.mxu1 %v2394_v58 }
 0x3ea   :  { %2397 = vmatpush1.bf16.msra.mxu1 %v2396_v63 }
 0x3eb   :  { %2399 = vmatprep.subr.bf16.mxu1 %v2398_v4 }
 0x3ee   :  { %2401 = vmatpush1.bf16.msra.mxu1 %v2400_v15 }
 0x3ef   :  { %2403 = vmatprep.subr.bf16.mxu1 %v2402_v9 }
 0x3f2   :  { %2405 = vmatpush1.bf16.msra.mxu1 %v2404_v3 }
 0x3f3   :  { %2407 = vmatprep.subr.bf16.mxu1 %v2406_v23 }
 0x3f6   :  { %2409 = vmatpush1.bf16.msra.mxu1 %v2408_v1 }
 0x3f7   :  { %2411 = vmatprep.subr.bf16.mxu1 %v2410_v27 }
 0x3fa   :  { %2413 = vmatpush1.bf16.msra.mxu1 %v2412_v31 }
 0x3fb   :  { %2415 = vmatprep.subr.bf16.mxu1 %v2414_v32 }
 0x3fe   :  { %2417 = vmatpush1.bf16.msra.mxu1 %v2416_v35 }
 0x401   :  { %1489 = vmatmul.mubr.f32.vlgmr.msra.gmra.mrb[4].mxu1 %v2756_v11 }
 0x402   :  { %1494 = vmatprep.mubr.f32.mxu1 %v2467_v0 }
 0x405   :  { %1495 = vmatmul.mubr.f32.gmra.mrb[6].mxu1 %v2758_v12 }
 0x4d4   :  { %v1490_v39 = vpop.f32.mrb[4].mxu1 }
 0x4d5   :  { %v1492_v40 = vpop.f32.mrb[5].mxu1  ;;  %v1521_v49 = vadd.f32 %v1514_v14, %v1490_v39 }
 0x4d6   :  { %v1522_v41 = vadd.f32 %v1518_v38, %v1492_v40 }
 0x4d8   :  { %v1525_v42 = vsub.f32 0.0, %v1522_v41  ;;  %v1496_v43 = vpop.f32.mrb[6].mxu1 }
 0x4d9   :  { %v1498_v44 = vpop.f32.mrb[7].mxu1  ;;  %v1523_v54 = vadd.f32 %v1514_v14, %v1496_v43 }
 0x4da   :  { %v1527_v45 = vmul.f32 1.442695, %v1525_v42  ;;  %v1524_v11 = vadd.f32 %v1518_v38, %v1498_v44 }
 0x4dc   :  { %2457 = vpow2.f32 %v1527_v45  ;;  %v1526_v0 = vsub.f32 0.0, %v1524_v11 }
 0x4de   :  { %v1529_v46 = vmul.f32 1.442695, %v1526_v0 }
 0x4e0   :  { %2459 = vpow2.f32 %v1529_v46 }
 0x4e6   :  { %v2458_v12 = vpop.eup %2457 }
 0x4e7   :  { %v1531_v18 = vadd.f32 1.0, %v2458_v12 }
 0x4e9   :  { %2461 = vrcp.f32 %v1531_v18 }
 0x4ea   :  { %v2460_v21 = vpop.eup %2459 }
 0x4eb   :  { %v1532_v48 = vadd.f32 1.0, %v2460_v21 }
 0x4ed   :  { %2463 = vrcp.f32 %v1532_v48 }
 0x4f3   :  { %v2462_v50 = vpop.eup %2461 }
 0x4f4   :  { %v1537_v51 = vmul.f32 %v2462_v50, %v1521_v49 }
 0x4f6   :  { %v1539_v53 = vadd.f32 %v2465_v52, %v1537_v51 }
 0x4f7   :  { %v2464_v55 = vpop.eup %2463 }
 0x4f8   :  { %1541 = vst [vmem:[%s3223_s8] sm:$0xff] %v1539_v53  ;;  %v1538_v56 = vmul.f32 %v2464_v55, %v1523_v54 }
 0x4fa   :  { %v1540_v58 = vadd.f32 %v2466_v57, %v1538_v56 }
 0x4fc   :  { %1542 = vst [vmem:[%s3223_s8 + $0x8] sm:$0xff] %v1540_v58 }

</bundles_post_ra>
